<compile_context>
chip_gen: v6e
topology: v6e:2x2x1
jax: 0.10.0
libtpu: 0.0.40
codegen_flags: <defaults>
</compile_context>

<pallas_src>
import jax
import jax.numpy as jnp
from jax import lax
from jax.experimental import pallas as pl
from jax.experimental.pallas import tpu as pltpu

# ---------------- small, deterministic config ----------------
VOCAB = 128
HIDDEN = 128
NUM_HEADS = 4
NUM_KV_HEADS = 2
GROUP = NUM_HEADS // NUM_KV_HEADS       # 2
HEAD_DIM = HIDDEN // NUM_HEADS          # 32
HALF = HEAD_DIM // 2                    # 16
Q_SIZE = NUM_HEADS * HEAD_DIM           # 128
KV_SIZE = NUM_KV_HEADS * HEAD_DIM       # 64
INTER = 256
NUM_LAYERS = 2
SEQ = 16
ROPE_THETA = 1.0e6
SCALE = float(HEAD_DIM) ** 0.5          # nGPT: scaling = head_dim ** 0.5

SQK_INIT_VALUE = 1.0
SQK_INIT_SCALING = 0.02                 # config.initializer_range
SUV_INIT_VALUE = 1.0
SUV_INIT_SCALING = 1.0
ALPHA_INIT_VALUE = 0.05
ALPHA_INIT_SCALING = 0.02               # config.initializer_range

NEG_BIG = -1e9                          # python float, folded into causal bias


# ---------------- kernel-side helpers ----------------
def _l2n(x):
    # normalize_vector(x, eps=0.0) via rsqrt (EUP) instead of sqrt + divide
    return x * lax.rsqrt(jnp.sum(x * x, axis=-1, keepdims=True))


# ---------------- Pallas kernel: both NGPTDecoderLayers, fully unrolled -----
def ngpt_fused_kernel(x_ref, cos_ref, sin_ref, headmask_ref, kbig_mask_ref,
                      vbig_mask_ref, blocksum_ref, causal_ref,
                      w_qkv_ref, w_o_ref, w_up_ref, w_down_ref,
                      sqk_ref, suv_ref, attn_lr_ref, mlp_lr_ref,
                      out_ref):
    h = x_ref[...]                         # (SEQ, HIDDEN) f32 running hidden
    cos = cos_ref[...]                     # (SEQ, HIDDEN) f32 (shared q / k_exp)
    sin = sin_ref[...]                     # (SEQ, HIDDEN) f32 (sign folded in)
    headmask = headmask_ref[...]           # (HIDDEN, HIDDEN) bf16 same-head 0/1
    kbig_mask = kbig_mask_ref[...]         # (NUM_HEADS*SEQ, HIDDEN) f32
    vbig_mask = vbig_mask_ref[...]         # (NUM_HEADS*SEQ, HIDDEN) f32
    blocksum = blocksum_ref[...]           # (NUM_HEADS*SEQ, NUM_HEADS*SEQ) bf16
    causal = causal_ref[...]               # (SEQ, NUM_HEADS*SEQ) f32 additive

    for layer in range(NUM_LAYERS):
        # ---- qkv projection: [q(128) | k lane-expanded(128) | v lane-expanded(128)]
        qkv = jnp.dot(h.astype(jnp.bfloat16), w_qkv_ref[layer],
                      preferred_element_type=jnp.float32)      # (SEQ, 384) f32
        q = qkv[:, :HIDDEN]
        k = qkv[:, HIDDEN:2 * HIDDEN]
        v = qkv[:, 2 * HIDDEN:]

        # ---- NeoX RoPE: rotate-half == full-slab roll, sign folded into sin
        q = q * cos + pltpu.roll(q, shift=HIDDEN // 2, axis=1) * sin
        k = k * cos + pltpu.roll(k, shift=HIDDEN // 2, axis=1) * sin

        # ---- per-head L2 normalize: same-head bf16 mask matmul + rsqrt (EUP)
        q_ss = jnp.dot((q * q).astype(jnp.bfloat16), headmask,
                       preferred_element_type=jnp.float32)
        qn = q * lax.rsqrt(q_ss) * sqk_ref[layer]    # sqk^2 * sqrt(head_dim)
        k_ss = jnp.dot((k * k).astype(jnp.bfloat16), headmask,
                       preferred_element_type=jnp.float32)
        kn = k * lax.rsqrt(k_ss)

        # ---- block-structured causal GQA attention (slab matmuls, no per-head loop)
        k_big = jnp.concatenate([kn] * NUM_HEADS, axis=0) * kbig_mask
        s = lax.dot_general(qn, k_big, (((1,), (1,)), ((), ())),
                            preferred_element_type=jnp.float32)  # (SEQ, H*SEQ)
        # unit q/k -> |score| <= sqk^2*sqrt(d): no max-subtraction needed
        p = jnp.exp(s + causal)
        denom = jnp.dot(p.astype(jnp.bfloat16), blocksum,
                        preferred_element_type=jnp.float32)      # per-head sums
        p = p * pl.reciprocal(denom, approx=True)
        v_big = jnp.concatenate([v] * NUM_HEADS, axis=0) * vbig_mask
        attn = jnp.dot(p.astype(jnp.bfloat16), v_big.astype(jnp.bfloat16),
                       preferred_element_type=jnp.float32)       # (SEQ, HIDDEN)

        o = jnp.dot(attn.astype(jnp.bfloat16), w_o_ref[layer],
                    preferred_element_type=jnp.float32)

        # ---- residual_update #1 (attention branch)
        a1 = _l2n(h)
        b1 = _l2n(o)
        h = _l2n(a1 + attn_lr_ref[layer] * (b1 - a1))

        # ---- nGPT MLP: up_proj -> silu(suv * up) -> down_proj
        up = jnp.dot(h.astype(jnp.bfloat16), w_up_ref[layer],
                     preferred_element_type=jnp.float32)
        gate = suv_ref[layer] * up
        act = gate * jax.nn.sigmoid(gate)                        # silu, f32
        mlp = jnp.dot(act.astype(jnp.bfloat16), w_down_ref[layer],
                      preferred_element_type=jnp.float32)

        # ---- residual_update #2 (mlp branch)
        a2 = _l2n(h)
        b2 = _l2n(mlp)
        h = _l2n(a2 + mlp_lr_ref[layer] * (b2 - a2))

    out_ref[...] = h


# ---------------- wrapper-side layout / packing helpers ----------------
def _perm_q():
    # kernel q layout: lane c = p*64 + h*16 + d  <-  original col h*32 + p*16 + d
    idx = [h * HEAD_DIM + p * HALF + d
           for p in range(2) for h in range(NUM_HEADS) for d in range(HALF)]
    return jnp.asarray(idx, dtype=jnp.int32)


def _perm_k_exp():
    # lane-expanded k: same (p, head, d) layout as q, values from kv head h//GROUP
    idx = [(h // GROUP) * HEAD_DIM + p * HALF + d
           for p in range(2) for h in range(NUM_HEADS) for d in range(HALF)]
    return jnp.asarray(idx, dtype=jnp.int32)


def _perm_v_exp():
    # lane-expanded v in the ORIGINAL per-head output layout (w_o unpermuted)
    idx = [(h // GROUP) * HEAD_DIM + d
           for h in range(NUM_HEADS) for d in range(HEAD_DIM)]
    return jnp.asarray(idx, dtype=jnp.int32)


def attention_constants(positions):
    # RoPE tables in the shared half-grouped 128-lane layout (q and k_exp)
    inv_freq = 1.0 / (ROPE_THETA ** (
        jnp.arange(0, HEAD_DIM, 2, dtype=jnp.float32) / HEAD_DIM))     # (HALF,)
    freqs = positions.astype(jnp.float32)[:, None] * inv_freq[None, :]  # (T, HALF)
    cos_h, sin_h = jnp.cos(freqs), jnp.sin(freqs)
    cos_tab = jnp.tile(cos_h, (1, HIDDEN // HALF))                       # (T, 128)
    sign = jnp.concatenate([-jnp.ones((1, HIDDEN // 2), jnp.float32),
                            jnp.ones((1, HIDDEN // 2), jnp.float32)], axis=-1)
    sin_tab = jnp.tile(sin_h, (1, HIDDEN // HALF)) * sign

    lane = jnp.arange(HIDDEN)
    lane_head = (lane % (HIDDEN // 2)) // HALF          # q / k_exp lane -> head
    headmask = (lane_head[:, None] == lane_head[None, :]).astype(jnp.bfloat16)

    j = jnp.arange(NUM_HEADS * SEQ)
    j_head = j // SEQ
    j_pos = j % SEQ
    kbig_mask = (lane_head[None, :] == j_head[:, None]).astype(jnp.float32)

    lane_vhead = lane // HEAD_DIM                       # v_exp / attn lane -> head
    vbig_mask = (lane_vhead[None, :] == j_head[:, None]).astype(jnp.float32)

    blocksum = (j_head[:, None] == j_head[None, :]).astype(jnp.bfloat16)

    t = jnp.arange(SEQ)
    causal = jnp.where(j_pos[None, :] <= t[:, None], 0.0, NEG_BIG)
    causal = causal.astype(jnp.float32)                 # (SEQ, NUM_HEADS*SEQ)
    return cos_tab, sin_tab, headmask, kbig_mask, vbig_mask, blocksum, causal


def pack_kernel_params(layers):
    perm_q = _perm_q()
    perm_k = _perm_k_exp()
    perm_v = _perm_v_exp()

    def one(p):
        wq = p["w_qkv"][:, :Q_SIZE][:, perm_q]
        wk = p["w_qkv"][:, Q_SIZE:Q_SIZE + KV_SIZE][:, perm_k]
        wv = p["w_qkv"][:, Q_SIZE + KV_SIZE:][:, perm_v]
        return dict(
            w_qkv=jnp.concatenate([wq, wk, wv], axis=-1).astype(jnp.bfloat16),
            w_o=p["w_o"].astype(jnp.bfloat16),
            w_up=p["w_up"].astype(jnp.bfloat16),
            w_down=p["w_down"].astype(jnp.bfloat16),
            sqk_eff=(p["sqk_sq"][0] * SCALE)[perm_q].reshape(1, Q_SIZE),
            suv_eff=p["suv_eff"],
            attn_lr=p["attn_lr"],
            mlp_lr=p["mlp_lr"],
        )

    per_layer = [one(p) for p in layers]
    return {k: jnp.stack([lp[k] for lp in per_layer]) for k in per_layer[0]}


def ngpt_forward_kernel(hidden, positions, stacked):
    consts = attention_constants(positions)
    # No grid: both layers unrolled in one program, every operand is a full
    # block resident in VMEM (total footprint < 1 MiB).
    # TODO(synk): for batch > 1, add a leading "parallel" grid axis over
    # sequences (fills the second v7x TensorCore and the MXU M dimension).
    return pl.pallas_call(
        ngpt_fused_kernel,
        out_shape=jax.ShapeDtypeStruct((SEQ, HIDDEN), jnp.float32),
    )(hidden, *consts,
      stacked["w_qkv"], stacked["w_o"], stacked["w_up"], stacked["w_down"],
      stacked["sqk_eff"], stacked["suv_eff"], stacked["attn_lr"],
      stacked["mlp_lr"])


# ---------------- parameter init (deterministic, synthetic) ----------------
def init_params(key):
    keys = jax.random.split(key, 2 + NUM_LAYERS)
    embed = 0.02 * jax.random.normal(keys[0], (VOCAB, HIDDEN), jnp.float32)
    layers = []
    for li in range(NUM_LAYERS):
        lk = jax.random.split(keys[2 + li], 8)
        w_qkv = 0.02 * jax.random.normal(lk[0], (HIDDEN, Q_SIZE + 2 * KV_SIZE),
                                         jnp.float32)
        w_o = 0.02 * jax.random.normal(lk[1], (Q_SIZE, HIDDEN), jnp.float32)
        w_up = 0.02 * jax.random.normal(lk[2], (HIDDEN, INTER), jnp.float32)
        w_down = 0.02 * jax.random.normal(lk[3], (INTER, HIDDEN), jnp.float32)
        # sqk / suv / alpha params (module init is constant; perturb
        # deterministically so the scaling math is actually exercised)
        sqk_w = SQK_INIT_SCALING * (
            1.0 + 0.1 * jax.random.normal(lk[4], (Q_SIZE,), jnp.float32))
        suv_w = SUV_INIT_SCALING * (
            1.0 + 0.1 * jax.random.normal(lk[5], (INTER,), jnp.float32))
        attn_alpha = ALPHA_INIT_SCALING * (
            1.0 + 0.1 * jax.random.normal(lk[6], (HIDDEN,), jnp.float32))
        mlp_alpha = ALPHA_INIT_SCALING * (
            1.0 + 0.1 * jax.random.normal(lk[7], (HIDDEN,), jnp.float32))

        sqk = sqk_w * (SQK_INIT_VALUE / SQK_INIT_SCALING)
        suv_eff = suv_w * (SUV_INIT_VALUE / SUV_INIT_SCALING * HIDDEN ** 0.5)
        attn_lr = jnp.abs(attn_alpha * (ALPHA_INIT_VALUE / ALPHA_INIT_SCALING))
        mlp_lr = jnp.abs(mlp_alpha * (ALPHA_INIT_VALUE / ALPHA_INIT_SCALING))

        layers.append(dict(
            w_qkv=w_qkv, w_o=w_o, w_up=w_up, w_down=w_down,
            sqk_sq=(sqk ** 2).reshape(1, Q_SIZE),
            suv_eff=suv_eff.reshape(1, INTER),
            attn_lr=attn_lr.reshape(1, HIDDEN),
            mlp_lr=mlp_lr.reshape(1, HIDDEN),
        ))
    return embed, layers


# ---------------- pure-JAX reference (mirrors the PyTorch forward) ----------
def _rope_neox_ref(xh, cos_f, sin_f):
    x1 = xh[:, :HALF]
    x2 = xh[:, HALF:]
    rot = jnp.concatenate([-x2, x1], axis=-1)
    return xh * cos_f + rot * sin_f


def _l2n_ref(x):
    return x / jnp.sqrt(jnp.sum(x * x, axis=-1, keepdims=True))


def reference_layer(x, cos_f, sin_f, p):
    hi = lax.Precision.HIGHEST
    qkv = jnp.dot(x, p["w_qkv"], precision=hi)
    q, k, v = (qkv[:, :Q_SIZE], qkv[:, Q_SIZE:Q_SIZE + KV_SIZE],
               qkv[:, Q_SIZE + KV_SIZE:])

    q_heads, k_heads, v_heads = [], [], []
    for h in range(NUM_HEADS):
        qh = _rope_neox_ref(q[:, h * HEAD_DIM:(h + 1) * HEAD_DIM], cos_f, sin_f)
        q_heads.append(_l2n_ref(qh) *
                       p["sqk_sq"][:, h * HEAD_DIM:(h + 1) * HEAD_DIM])
    for h in range(NUM_KV_HEADS):
        kh = _rope_neox_ref(k[:, h * HEAD_DIM:(h + 1) * HEAD_DIM], cos_f, sin_f)
        k_heads.append(_l2n_ref(kh))
        v_heads.append(v[:, h * HEAD_DIM:(h + 1) * HEAD_DIM])

    T = x.shape[0]
    causal = jnp.tril(jnp.ones((T, T), dtype=bool))
    outs = []
    for h in range(NUM_HEADS):
        kv = h // GROUP
        s = jnp.dot(q_heads[h], k_heads[kv].T, precision=hi) * SCALE
        s = jnp.where(causal, s, NEG_BIG)
        pm = jax.nn.softmax(s, axis=-1)
        outs.append(jnp.dot(pm, v_heads[kv], precision=hi))
    o = jnp.dot(jnp.concatenate(outs, axis=-1), p["w_o"], precision=hi)

    a = _l2n_ref(x)
    b = _l2n_ref(o)
    h1 = _l2n_ref(a + p["attn_lr"] * (b - a))

    up = jnp.dot(h1, p["w_up"], precision=hi)
    gate = p["suv_eff"] * up
    act = gate * jax.nn.sigmoid(gate)
    mlp = jnp.dot(act, p["w_down"], precision=hi)

    a2 = _l2n_ref(h1)
    b2 = _l2n_ref(mlp)
    return _l2n_ref(a2 + p["mlp_lr"] * (b2 - a2))


# ---------------- full model ----------------
def ngpt_model(input_ids, positions, embed, layers, use_kernel=True):
    # TODO(synk): embedding gather (VocabParallelEmbedding) stays as plain-JAX
    # glue and vLLM's paged-KV Attention is implemented as dense causal GQA
    # over the in-VMEM sequence (no KV cache / paging).
    hidden = jnp.take(embed, input_ids, axis=0)
    if use_kernel:
        stacked = pack_kernel_params(layers)
        return ngpt_forward_kernel(hidden, positions, stacked)
    inv_freq = 1.0 / (ROPE_THETA ** (
        jnp.arange(0, HEAD_DIM, 2, dtype=jnp.float32) / HEAD_DIM))
    freqs = positions.astype(jnp.float32)[:, None] * inv_freq[None, :]
    cos_f = jnp.concatenate([jnp.cos(freqs)] * 2, axis=-1)
    sin_f = jnp.concatenate([jnp.sin(freqs)] * 2, axis=-1)
    for p in layers:
        hidden = reference_layer(hidden, cos_f, sin_f, p)
    return hidden


if __name__ == "__main__":
    key = jax.random.PRNGKey(0)
    k_ids, k_params = jax.random.split(key)
    input_ids = jax.random.randint(k_ids, (SEQ,), 0, VOCAB, dtype=jnp.int32)
    positions = jnp.arange(SEQ, dtype=jnp.int32)

    embed, layers = init_params(k_params)

    out = ngpt_model(input_ids, positions, embed, layers, use_kernel=True)
    out = jax.block_until_ready(out)

    ref = ngpt_model(input_ids, positions, embed, layers, use_kernel=False)
    ref = jax.block_until_ready(ref)

    assert out.shape == (SEQ, HIDDEN)
    assert bool(jnp.all(jnp.isfinite(out)))
    max_diff = float(jnp.max(jnp.abs(out - ref)))
    assert jnp.allclose(out, ref, atol=2e-2, rtol=2e-2), f"max abs diff {max_diff}"

    print("KERNEL_OK")
</pallas_src>

<mosaic_0001>
module attributes {stable_mosaic.version = 11 : i64} {
  func.func @ngpt_fused_kernel(%arg0: memref<16x128xf32, #tpu.memory_space<vmem>>, %arg1: memref<16x128xf32, #tpu.memory_space<vmem>>, %arg2: memref<16x128xf32, #tpu.memory_space<vmem>>, %arg3: memref<128x128xbf16, #tpu.memory_space<vmem>>, %arg4: memref<64x128xf32, #tpu.memory_space<vmem>>, %arg5: memref<64x128xf32, #tpu.memory_space<vmem>>, %arg6: memref<64x64xbf16, #tpu.memory_space<vmem>>, %arg7: memref<16x64xf32, #tpu.memory_space<vmem>>, %arg8: memref<2x128x384xbf16, #tpu.memory_space<vmem>>, %arg9: memref<2x128x128xbf16, #tpu.memory_space<vmem>>, %arg10: memref<2x128x256xbf16, #tpu.memory_space<vmem>>, %arg11: memref<2x256x128xbf16, #tpu.memory_space<vmem>>, %arg12: memref<2x1x128xf32, #tpu.memory_space<vmem>>, %arg13: memref<2x1x256xf32, #tpu.memory_space<vmem>>, %arg14: memref<2x1x128xf32, #tpu.memory_space<vmem>>, %arg15: memref<2x1x128xf32, #tpu.memory_space<vmem>>, %arg16: memref<16x128xf32, #tpu.memory_space<vmem>>) attributes {dimension_semantics = [], scalar_prefetch = 0 : i64, scratch_operands = 0 : i64, tpu.core_type = #tpu.core_type<tc>} {
    %c0 = arith.constant 0 : index
    %c0_0 = arith.constant 0 : index
    %0 = vector.load %arg0[%c0, %c0_0] : memref<16x128xf32, #tpu.memory_space<vmem>>, vector<16x128xf32>
    %c0_1 = arith.constant 0 : index
    %c0_2 = arith.constant 0 : index
    %1 = vector.load %arg1[%c0_1, %c0_2] : memref<16x128xf32, #tpu.memory_space<vmem>>, vector<16x128xf32>
    %c0_3 = arith.constant 0 : index
    %c0_4 = arith.constant 0 : index
    %2 = vector.load %arg2[%c0_3, %c0_4] : memref<16x128xf32, #tpu.memory_space<vmem>>, vector<16x128xf32>
    %c0_5 = arith.constant 0 : index
    %c0_6 = arith.constant 0 : index
    %3 = vector.load %arg3[%c0_5, %c0_6] : memref<128x128xbf16, #tpu.memory_space<vmem>>, vector<128x128xbf16>
    %c0_7 = arith.constant 0 : index
    %c0_8 = arith.constant 0 : index
    %4 = vector.load %arg4[%c0_7, %c0_8] : memref<64x128xf32, #tpu.memory_space<vmem>>, vector<64x128xf32>
    %c0_9 = arith.constant 0 : index
    %c0_10 = arith.constant 0 : index
    %5 = vector.load %arg5[%c0_9, %c0_10] : memref<64x128xf32, #tpu.memory_space<vmem>>, vector<64x128xf32>
    %c0_11 = arith.constant 0 : index
    %c0_12 = arith.constant 0 : index
    %6 = vector.load %arg6[%c0_11, %c0_12] : memref<64x64xbf16, #tpu.memory_space<vmem>>, vector<64x64xbf16>
    %c0_13 = arith.constant 0 : index
    %c0_14 = arith.constant 0 : index
    %7 = vector.load %arg7[%c0_13, %c0_14] : memref<16x64xf32, #tpu.memory_space<vmem>>, vector<16x64xf32>
    %8 = arith.truncf %0 : vector<16x128xf32> to vector<16x128xbf16>
    %c0_15 = arith.constant 0 : index
    %c0_16 = arith.constant 0 : index
    %c0_17 = arith.constant 0 : index
    %9 = vector.load %arg8[%c0_15, %c0_16, %c0_17] : memref<2x128x384xbf16, #tpu.memory_space<vmem>>, vector<1x128x384xbf16>
    %10 = vector.shape_cast %9 : vector<1x128x384xbf16> to vector<128x384xbf16>
    %cst = arith.constant dense<0.000000e+00> : vector<16x384xf32>
    %11 = tpu.matmul %8, %10, %cst {dimension_numbers = #tpu.dot_dimension_numbers<[1], [0], [0], [1], [0, 0, 1, 1], [], []>} : vector<16x128xbf16>, vector<128x384xbf16>, vector<16x384xf32> -> vector<16x384xf32>
    %12 = vector.extract_strided_slice %11 {offsets = [0, 0], sizes = [16, 128], strides = [1, 1]} : vector<16x384xf32> to vector<16x128xf32>
    %13 = vector.extract_strided_slice %11 {offsets = [0, 128], sizes = [16, 128], strides = [1, 1]} : vector<16x384xf32> to vector<16x128xf32>
    %14 = vector.extract_strided_slice %11 {offsets = [0, 256], sizes = [16, 128], strides = [1, 1]} : vector<16x384xf32> to vector<16x128xf32>
    %15 = arith.mulf %12, %1 : vector<16x128xf32>
    %c64_i32 = arith.constant 64 : i32
    %16 = tpu.dynamic_rotate %12 by %c64_i32 dim 1 : vector<16x128xf32>, i32 -> vector<16x128xf32>
    %17 = arith.mulf %16, %2 : vector<16x128xf32>
    %18 = arith.addf %15, %17 : vector<16x128xf32>
    %19 = arith.mulf %13, %1 : vector<16x128xf32>
    %c64_i32_18 = arith.constant 64 : i32
    %20 = tpu.dynamic_rotate %13 by %c64_i32_18 dim 1 : vector<16x128xf32>, i32 -> vector<16x128xf32>
    %21 = arith.mulf %20, %2 : vector<16x128xf32>
    %22 = arith.addf %19, %21 : vector<16x128xf32>
    %23 = arith.mulf %18, %18 : vector<16x128xf32>
    %24 = arith.truncf %23 : vector<16x128xf32> to vector<16x128xbf16>
    %cst_19 = arith.constant dense<0.000000e+00> : vector<16x128xf32>
    %25 = tpu.matmul %24, %3, %cst_19 {dimension_numbers = #tpu.dot_dimension_numbers<[1], [0], [0], [1], [0, 0, 1, 1], [], []>} : vector<16x128xbf16>, vector<128x128xbf16>, vector<16x128xf32> -> vector<16x128xf32>
    %26 = math.rsqrt %25 : vector<16x128xf32>
    %27 = arith.mulf %18, %26 : vector<16x128xf32>
    %c0_20 = arith.constant 0 : index
    %c0_21 = arith.constant 0 : index
    %c0_22 = arith.constant 0 : index
    %28 = vector.load %arg12[%c0_20, %c0_21, %c0_22] : memref<2x1x128xf32, #tpu.memory_space<vmem>>, vector<1x1x128xf32>
    %29 = vector.shape_cast %28 : vector<1x1x128xf32> to vector<1x128xf32>
    %30 = vector.broadcast %29 : vector<1x128xf32> to vector<16x128xf32>
    %31 = arith.mulf %27, %30 : vector<16x128xf32>
    %32 = arith.mulf %22, %22 : vector<16x128xf32>
    %33 = arith.truncf %32 : vector<16x128xf32> to vector<16x128xbf16>
    %cst_23 = arith.constant dense<0.000000e+00> : vector<16x128xf32>
    %34 = tpu.matmul %33, %3, %cst_23 {dimension_numbers = #tpu.dot_dimension_numbers<[1], [0], [0], [1], [0, 0, 1, 1], [], []>} : vector<16x128xbf16>, vector<128x128xbf16>, vector<16x128xf32> -> vector<16x128xf32>
    %35 = math.rsqrt %34 : vector<16x128xf32>
    %36 = arith.mulf %22, %35 : vector<16x128xf32>
    %37 = tpu.concatenate %36, %36, %36, %36 in 0 : vector<16x128xf32>, vector<16x128xf32>, vector<16x128xf32>, vector<16x128xf32> -> vector<64x128xf32>
    %38 = arith.mulf %37, %4 : vector<64x128xf32>
    %cst_24 = arith.constant dense<0.000000e+00> : vector<16x64xf32>
    %39 = tpu.matmul %31, %38, %cst_24 {dimension_numbers = #tpu.dot_dimension_numbers<[1], [1], [0], [0], [0, 0, 1, 0], [], []>} : vector<16x128xf32>, vector<64x128xf32>, vector<16x64xf32> -> vector<16x64xf32>
    %40 = arith.addf %39, %7 : vector<16x64xf32>
    %41 = math.exp %40 : vector<16x64xf32>
    %42 = arith.truncf %41 : vector<16x64xf32> to vector<16x64xbf16>
    %cst_25 = arith.constant dense<0.000000e+00> : vector<16x64xf32>
    %43 = tpu.matmul %42, %6, %cst_25 {dimension_numbers = #tpu.dot_dimension_numbers<[1], [0], [0], [1], [0, 0, 1, 1], [], []>} : vector<16x64xbf16>, vector<64x64xbf16>, vector<16x64xf32> -> vector<16x64xf32>
    %44 = tpu.reciprocal %43 {approx = true} : vector<16x64xf32> -> vector<16x64xf32>
    %45 = arith.mulf %41, %44 : vector<16x64xf32>
    %46 = tpu.concatenate %14, %14, %14, %14 in 0 : vector<16x128xf32>, vector<16x128xf32>, vector<16x128xf32>, vector<16x128xf32> -> vector<64x128xf32>
    %47 = arith.mulf %46, %5 : vector<64x128xf32>
    %48 = arith.truncf %45 : vector<16x64xf32> to vector<16x64xbf16>
    %49 = arith.truncf %47 : vector<64x128xf32> to vector<64x128xbf16>
    %cst_26 = arith.constant dense<0.000000e+00> : vector<16x128xf32>
    %50 = tpu.matmul %48, %49, %cst_26 {dimension_numbers = #tpu.dot_dimension_numbers<[1], [0], [0], [1], [0, 0, 1, 1], [], []>} : vector<16x64xbf16>, vector<64x128xbf16>, vector<16x128xf32> -> vector<16x128xf32>
    %51 = arith.truncf %50 : vector<16x128xf32> to vector<16x128xbf16>
    %c0_27 = arith.constant 0 : index
    %c0_28 = arith.constant 0 : index
    %c0_29 = arith.constant 0 : index
    %52 = vector.load %arg9[%c0_27, %c0_28, %c0_29] : memref<2x128x128xbf16, #tpu.memory_space<vmem>>, vector<1x128x128xbf16>
    %53 = vector.shape_cast %52 : vector<1x128x128xbf16> to vector<128x128xbf16>
    %cst_30 = arith.constant dense<0.000000e+00> : vector<16x128xf32>
    %54 = tpu.matmul %51, %53, %cst_30 {dimension_numbers = #tpu.dot_dimension_numbers<[1], [0], [0], [1], [0, 0, 1, 1], [], []>} : vector<16x128xbf16>, vector<128x128xbf16>, vector<16x128xf32> -> vector<16x128xf32>
    %55 = arith.mulf %0, %0 : vector<16x128xf32>
    %cst_31 = arith.constant dense<0.000000e+00> : vector<16xf32>
    %56 = vector.multi_reduction <add>, %55, %cst_31 [1] : vector<16x128xf32> to vector<16xf32>
    %57 = vector.shape_cast %56 : vector<16xf32> to vector<16x1xf32>
    %58 = math.rsqrt %57 : vector<16x1xf32>
    %59 = vector.broadcast %58 : vector<16x1xf32> to vector<16x128xf32>
    %60 = arith.mulf %0, %59 : vector<16x128xf32>
    %61 = arith.mulf %54, %54 : vector<16x128xf32>
    %cst_32 = arith.constant dense<0.000000e+00> : vector<16xf32>
    %62 = vector.multi_reduction <add>, %61, %cst_32 [1] : vector<16x128xf32> to vector<16xf32>
    %63 = vector.shape_cast %62 : vector<16xf32> to vector<16x1xf32>
    %64 = math.rsqrt %63 : vector<16x1xf32>
    %65 = vector.broadcast %64 : vector<16x1xf32> to vector<16x128xf32>
    %66 = arith.mulf %54, %65 : vector<16x128xf32>
    %c0_33 = arith.constant 0 : index
    %c0_34 = arith.constant 0 : index
    %c0_35 = arith.constant 0 : index
    %67 = vector.load %arg14[%c0_33, %c0_34, %c0_35] : memref<2x1x128xf32, #tpu.memory_space<vmem>>, vector<1x1x128xf32>
    %68 = vector.shape_cast %67 : vector<1x1x128xf32> to vector<1x128xf32>
    %69 = arith.subf %66, %60 : vector<16x128xf32>
    %70 = vector.broadcast %68 : vector<1x128xf32> to vector<16x128xf32>
    %71 = arith.mulf %70, %69 : vector<16x128xf32>
    %72 = arith.addf %60, %71 : vector<16x128xf32>
    %73 = arith.mulf %72, %72 : vector<16x128xf32>
    %cst_36 = arith.constant dense<0.000000e+00> : vector<16xf32>
    %74 = vector.multi_reduction <add>, %73, %cst_36 [1] : vector<16x128xf32> to vector<16xf32>
    %75 = vector.shape_cast %74 : vector<16xf32> to vector<16x1xf32>
    %76 = math.rsqrt %75 : vector<16x1xf32>
    %77 = vector.broadcast %76 : vector<16x1xf32> to vector<16x128xf32>
    %78 = arith.mulf %72, %77 : vector<16x128xf32>
    %79 = arith.truncf %78 : vector<16x128xf32> to vector<16x128xbf16>
    %c0_37 = arith.constant 0 : index
    %c0_38 = arith.constant 0 : index
    %c0_39 = arith.constant 0 : index
    %80 = vector.load %arg10[%c0_37, %c0_38, %c0_39] : memref<2x128x256xbf16, #tpu.memory_space<vmem>>, vector<1x128x256xbf16>
    %81 = vector.shape_cast %80 : vector<1x128x256xbf16> to vector<128x256xbf16>
    %cst_40 = arith.constant dense<0.000000e+00> : vector<16x256xf32>
    %82 = tpu.matmul %79, %81, %cst_40 {dimension_numbers = #tpu.dot_dimension_numbers<[1], [0], [0], [1], [0, 0, 1, 1], [], []>} : vector<16x128xbf16>, vector<128x256xbf16>, vector<16x256xf32> -> vector<16x256xf32>
    %c0_41 = arith.constant 0 : index
    %c0_42 = arith.constant 0 : index
    %c0_43 = arith.constant 0 : index
    %83 = vector.load %arg13[%c0_41, %c0_42, %c0_43] : memref<2x1x256xf32, #tpu.memory_space<vmem>>, vector<1x1x256xf32>
    %84 = vector.shape_cast %83 : vector<1x1x256xf32> to vector<1x256xf32>
    %85 = vector.broadcast %84 : vector<1x256xf32> to vector<16x256xf32>
    %86 = arith.mulf %85, %82 : vector<16x256xf32>
    %87 = arith.negf %86 : vector<16x256xf32>
    %88 = math.exp %87 : vector<16x256xf32>
    %cst_44 = arith.constant 1.000000e+00 : f32
    %89 = vector.broadcast %cst_44 : f32 to vector<16x256xf32>
    %90 = arith.addf %89, %88 : vector<16x256xf32>
    %91 = arith.divf %89, %90 : vector<16x256xf32>
    %92 = arith.mulf %86, %91 : vector<16x256xf32>
    %93 = arith.truncf %92 : vector<16x256xf32> to vector<16x256xbf16>
    %c0_45 = arith.constant 0 : index
    %c0_46 = arith.constant 0 : index
    %c0_47 = arith.constant 0 : index
    %94 = vector.load %arg11[%c0_45, %c0_46, %c0_47] : memref<2x256x128xbf16, #tpu.memory_space<vmem>>, vector<1x256x128xbf16>
    %95 = vector.shape_cast %94 : vector<1x256x128xbf16> to vector<256x128xbf16>
    %cst_48 = arith.constant dense<0.000000e+00> : vector<16x128xf32>
    %96 = tpu.matmul %93, %95, %cst_48 {dimension_numbers = #tpu.dot_dimension_numbers<[1], [0], [0], [1], [0, 0, 1, 1], [], []>} : vector<16x256xbf16>, vector<256x128xbf16>, vector<16x128xf32> -> vector<16x128xf32>
    %97 = arith.mulf %78, %78 : vector<16x128xf32>
    %cst_49 = arith.constant dense<0.000000e+00> : vector<16xf32>
    %98 = vector.multi_reduction <add>, %97, %cst_49 [1] : vector<16x128xf32> to vector<16xf32>
    %99 = vector.shape_cast %98 : vector<16xf32> to vector<16x1xf32>
    %100 = math.rsqrt %99 : vector<16x1xf32>
    %101 = vector.broadcast %100 : vector<16x1xf32> to vector<16x128xf32>
    %102 = arith.mulf %78, %101 : vector<16x128xf32>
    %103 = arith.mulf %96, %96 : vector<16x128xf32>
    %cst_50 = arith.constant dense<0.000000e+00> : vector<16xf32>
    %104 = vector.multi_reduction <add>, %103, %cst_50 [1] : vector<16x128xf32> to vector<16xf32>
    %105 = vector.shape_cast %104 : vector<16xf32> to vector<16x1xf32>
    %106 = math.rsqrt %105 : vector<16x1xf32>
    %107 = vector.broadcast %106 : vector<16x1xf32> to vector<16x128xf32>
    %108 = arith.mulf %96, %107 : vector<16x128xf32>
    %c0_51 = arith.constant 0 : index
    %c0_52 = arith.constant 0 : index
    %c0_53 = arith.constant 0 : index
    %109 = vector.load %arg15[%c0_51, %c0_52, %c0_53] : memref<2x1x128xf32, #tpu.memory_space<vmem>>, vector<1x1x128xf32>
    %110 = vector.shape_cast %109 : vector<1x1x128xf32> to vector<1x128xf32>
    %111 = arith.subf %108, %102 : vector<16x128xf32>
    %112 = vector.broadcast %110 : vector<1x128xf32> to vector<16x128xf32>
    %113 = arith.mulf %112, %111 : vector<16x128xf32>
    %114 = arith.addf %102, %113 : vector<16x128xf32>
    %115 = arith.mulf %114, %114 : vector<16x128xf32>
    %cst_54 = arith.constant dense<0.000000e+00> : vector<16xf32>
    %116 = vector.multi_reduction <add>, %115, %cst_54 [1] : vector<16x128xf32> to vector<16xf32>
    %117 = vector.shape_cast %116 : vector<16xf32> to vector<16x1xf32>
    %118 = math.rsqrt %117 : vector<16x1xf32>
    %119 = vector.broadcast %118 : vector<16x1xf32> to vector<16x128xf32>
    %120 = arith.mulf %114, %119 : vector<16x128xf32>
    %121 = arith.truncf %120 : vector<16x128xf32> to vector<16x128xbf16>
    %c1 = arith.constant 1 : index
    %c0_55 = arith.constant 0 : index
    %c0_56 = arith.constant 0 : index
    %122 = vector.load %arg8[%c1, %c0_55, %c0_56] : memref<2x128x384xbf16, #tpu.memory_space<vmem>>, vector<1x128x384xbf16>
    %123 = vector.shape_cast %122 : vector<1x128x384xbf16> to vector<128x384xbf16>
    %cst_57 = arith.constant dense<0.000000e+00> : vector<16x384xf32>
    %124 = tpu.matmul %121, %123, %cst_57 {dimension_numbers = #tpu.dot_dimension_numbers<[1], [0], [0], [1], [0, 0, 1, 1], [], []>} : vector<16x128xbf16>, vector<128x384xbf16>, vector<16x384xf32> -> vector<16x384xf32>
    %125 = vector.extract_strided_slice %124 {offsets = [0, 0], sizes = [16, 128], strides = [1, 1]} : vector<16x384xf32> to vector<16x128xf32>
    %126 = vector.extract_strided_slice %124 {offsets = [0, 128], sizes = [16, 128], strides = [1, 1]} : vector<16x384xf32> to vector<16x128xf32>
    %127 = vector.extract_strided_slice %124 {offsets = [0, 256], sizes = [16, 128], strides = [1, 1]} : vector<16x384xf32> to vector<16x128xf32>
    %128 = arith.mulf %125, %1 : vector<16x128xf32>
    %c64_i32_58 = arith.constant 64 : i32
    %129 = tpu.dynamic_rotate %125 by %c64_i32_58 dim 1 : vector<16x128xf32>, i32 -> vector<16x128xf32>
    %130 = arith.mulf %129, %2 : vector<16x128xf32>
    %131 = arith.addf %128, %130 : vector<16x128xf32>
    %132 = arith.mulf %126, %1 : vector<16x128xf32>
    %c64_i32_59 = arith.constant 64 : i32
    %133 = tpu.dynamic_rotate %126 by %c64_i32_59 dim 1 : vector<16x128xf32>, i32 -> vector<16x128xf32>
    %134 = arith.mulf %133, %2 : vector<16x128xf32>
    %135 = arith.addf %132, %134 : vector<16x128xf32>
    %136 = arith.mulf %131, %131 : vector<16x128xf32>
    %137 = arith.truncf %136 : vector<16x128xf32> to vector<16x128xbf16>
    %cst_60 = arith.constant dense<0.000000e+00> : vector<16x128xf32>
    %138 = tpu.matmul %137, %3, %cst_60 {dimension_numbers = #tpu.dot_dimension_numbers<[1], [0], [0], [1], [0, 0, 1, 1], [], []>} : vector<16x128xbf16>, vector<128x128xbf16>, vector<16x128xf32> -> vector<16x128xf32>
    %139 = math.rsqrt %138 : vector<16x128xf32>
    %140 = arith.mulf %131, %139 : vector<16x128xf32>
    %c1_61 = arith.constant 1 : index
    %c0_62 = arith.constant 0 : index
    %c0_63 = arith.constant 0 : index
    %141 = vector.load %arg12[%c1_61, %c0_62, %c0_63] : memref<2x1x128xf32, #tpu.memory_space<vmem>>, vector<1x1x128xf32>
    %142 = vector.shape_cast %141 : vector<1x1x128xf32> to vector<1x128xf32>
    %143 = vector.broadcast %142 : vector<1x128xf32> to vector<16x128xf32>
    %144 = arith.mulf %140, %143 : vector<16x128xf32>
    %145 = arith.mulf %135, %135 : vector<16x128xf32>
    %146 = arith.truncf %145 : vector<16x128xf32> to vector<16x128xbf16>
    %cst_64 = arith.constant dense<0.000000e+00> : vector<16x128xf32>
    %147 = tpu.matmul %146, %3, %cst_64 {dimension_numbers = #tpu.dot_dimension_numbers<[1], [0], [0], [1], [0, 0, 1, 1], [], []>} : vector<16x128xbf16>, vector<128x128xbf16>, vector<16x128xf32> -> vector<16x128xf32>
    %148 = math.rsqrt %147 : vector<16x128xf32>
    %149 = arith.mulf %135, %148 : vector<16x128xf32>
    %150 = tpu.concatenate %149, %149, %149, %149 in 0 : vector<16x128xf32>, vector<16x128xf32>, vector<16x128xf32>, vector<16x128xf32> -> vector<64x128xf32>
    %151 = arith.mulf %150, %4 : vector<64x128xf32>
    %cst_65 = arith.constant dense<0.000000e+00> : vector<16x64xf32>
    %152 = tpu.matmul %144, %151, %cst_65 {dimension_numbers = #tpu.dot_dimension_numbers<[1], [1], [0], [0], [0, 0, 1, 0], [], []>} : vector<16x128xf32>, vector<64x128xf32>, vector<16x64xf32> -> vector<16x64xf32>
    %153 = arith.addf %152, %7 : vector<16x64xf32>
    %154 = math.exp %153 : vector<16x64xf32>
    %155 = arith.truncf %154 : vector<16x64xf32> to vector<16x64xbf16>
    %cst_66 = arith.constant dense<0.000000e+00> : vector<16x64xf32>
    %156 = tpu.matmul %155, %6, %cst_66 {dimension_numbers = #tpu.dot_dimension_numbers<[1], [0], [0], [1], [0, 0, 1, 1], [], []>} : vector<16x64xbf16>, vector<64x64xbf16>, vector<16x64xf32> -> vector<16x64xf32>
    %157 = tpu.reciprocal %156 {approx = true} : vector<16x64xf32> -> vector<16x64xf32>
    %158 = arith.mulf %154, %157 : vector<16x64xf32>
    %159 = tpu.concatenate %127, %127, %127, %127 in 0 : vector<16x128xf32>, vector<16x128xf32>, vector<16x128xf32>, vector<16x128xf32> -> vector<64x128xf32>
    %160 = arith.mulf %159, %5 : vector<64x128xf32>
    %161 = arith.truncf %158 : vector<16x64xf32> to vector<16x64xbf16>
    %162 = arith.truncf %160 : vector<64x128xf32> to vector<64x128xbf16>
    %cst_67 = arith.constant dense<0.000000e+00> : vector<16x128xf32>
    %163 = tpu.matmul %161, %162, %cst_67 {dimension_numbers = #tpu.dot_dimension_numbers<[1], [0], [0], [1], [0, 0, 1, 1], [], []>} : vector<16x64xbf16>, vector<64x128xbf16>, vector<16x128xf32> -> vector<16x128xf32>
    %164 = arith.truncf %163 : vector<16x128xf32> to vector<16x128xbf16>
    %c1_68 = arith.constant 1 : index
    %c0_69 = arith.constant 0 : index
    %c0_70 = arith.constant 0 : index
    %165 = vector.load %arg9[%c1_68, %c0_69, %c0_70] : memref<2x128x128xbf16, #tpu.memory_space<vmem>>, vector<1x128x128xbf16>
    %166 = vector.shape_cast %165 : vector<1x128x128xbf16> to vector<128x128xbf16>
    %cst_71 = arith.constant dense<0.000000e+00> : vector<16x128xf32>
    %167 = tpu.matmul %164, %166, %cst_71 {dimension_numbers = #tpu.dot_dimension_numbers<[1], [0], [0], [1], [0, 0, 1, 1], [], []>} : vector<16x128xbf16>, vector<128x128xbf16>, vector<16x128xf32> -> vector<16x128xf32>
    %168 = arith.mulf %120, %120 : vector<16x128xf32>
    %cst_72 = arith.constant dense<0.000000e+00> : vector<16xf32>
    %169 = vector.multi_reduction <add>, %168, %cst_72 [1] : vector<16x128xf32> to vector<16xf32>
    %170 = vector.shape_cast %169 : vector<16xf32> to vector<16x1xf32>
    %171 = math.rsqrt %170 : vector<16x1xf32>
    %172 = vector.broadcast %171 : vector<16x1xf32> to vector<16x128xf32>
    %173 = arith.mulf %120, %172 : vector<16x128xf32>
    %174 = arith.mulf %167, %167 : vector<16x128xf32>
    %cst_73 = arith.constant dense<0.000000e+00> : vector<16xf32>
    %175 = vector.multi_reduction <add>, %174, %cst_73 [1] : vector<16x128xf32> to vector<16xf32>
    %176 = vector.shape_cast %175 : vector<16xf32> to vector<16x1xf32>
    %177 = math.rsqrt %176 : vector<16x1xf32>
    %178 = vector.broadcast %177 : vector<16x1xf32> to vector<16x128xf32>
    %179 = arith.mulf %167, %178 : vector<16x128xf32>
    %c1_74 = arith.constant 1 : index
    %c0_75 = arith.constant 0 : index
    %c0_76 = arith.constant 0 : index
    %180 = vector.load %arg14[%c1_74, %c0_75, %c0_76] : memref<2x1x128xf32, #tpu.memory_space<vmem>>, vector<1x1x128xf32>
    %181 = vector.shape_cast %180 : vector<1x1x128xf32> to vector<1x128xf32>
    %182 = arith.subf %179, %173 : vector<16x128xf32>
    %183 = vector.broadcast %181 : vector<1x128xf32> to vector<16x128xf32>
    %184 = arith.mulf %183, %182 : vector<16x128xf32>
    %185 = arith.addf %173, %184 : vector<16x128xf32>
    %186 = arith.mulf %185, %185 : vector<16x128xf32>
    %cst_77 = arith.constant dense<0.000000e+00> : vector<16xf32>
    %187 = vector.multi_reduction <add>, %186, %cst_77 [1] : vector<16x128xf32> to vector<16xf32>
    %188 = vector.shape_cast %187 : vector<16xf32> to vector<16x1xf32>
    %189 = math.rsqrt %188 : vector<16x1xf32>
    %190 = vector.broadcast %189 : vector<16x1xf32> to vector<16x128xf32>
    %191 = arith.mulf %185, %190 : vector<16x128xf32>
    %192 = arith.truncf %191 : vector<16x128xf32> to vector<16x128xbf16>
    %c1_78 = arith.constant 1 : index
    %c0_79 = arith.constant 0 : index
    %c0_80 = arith.constant 0 : index
    %193 = vector.load %arg10[%c1_78, %c0_79, %c0_80] : memref<2x128x256xbf16, #tpu.memory_space<vmem>>, vector<1x128x256xbf16>
    %194 = vector.shape_cast %193 : vector<1x128x256xbf16> to vector<128x256xbf16>
    %cst_81 = arith.constant dense<0.000000e+00> : vector<16x256xf32>
    %195 = tpu.matmul %192, %194, %cst_81 {dimension_numbers = #tpu.dot_dimension_numbers<[1], [0], [0], [1], [0, 0, 1, 1], [], []>} : vector<16x128xbf16>, vector<128x256xbf16>, vector<16x256xf32> -> vector<16x256xf32>
    %c1_82 = arith.constant 1 : index
    %c0_83 = arith.constant 0 : index
    %c0_84 = arith.constant 0 : index
    %196 = vector.load %arg13[%c1_82, %c0_83, %c0_84] : memref<2x1x256xf32, #tpu.memory_space<vmem>>, vector<1x1x256xf32>
    %197 = vector.shape_cast %196 : vector<1x1x256xf32> to vector<1x256xf32>
    %198 = vector.broadcast %197 : vector<1x256xf32> to vector<16x256xf32>
    %199 = arith.mulf %198, %195 : vector<16x256xf32>
    %200 = arith.negf %199 : vector<16x256xf32>
    %201 = math.exp %200 : vector<16x256xf32>
    %cst_85 = arith.constant 1.000000e+00 : f32
    %202 = vector.broadcast %cst_85 : f32 to vector<16x256xf32>
    %203 = arith.addf %202, %201 : vector<16x256xf32>
    %204 = arith.divf %202, %203 : vector<16x256xf32>
    %205 = arith.mulf %199, %204 : vector<16x256xf32>
    %206 = arith.truncf %205 : vector<16x256xf32> to vector<16x256xbf16>
    %c1_86 = arith.constant 1 : index
    %c0_87 = arith.constant 0 : index
    %c0_88 = arith.constant 0 : index
    %207 = vector.load %arg11[%c1_86, %c0_87, %c0_88] : memref<2x256x128xbf16, #tpu.memory_space<vmem>>, vector<1x256x128xbf16>
    %208 = vector.shape_cast %207 : vector<1x256x128xbf16> to vector<256x128xbf16>
    %cst_89 = arith.constant dense<0.000000e+00> : vector<16x128xf32>
    %209 = tpu.matmul %206, %208, %cst_89 {dimension_numbers = #tpu.dot_dimension_numbers<[1], [0], [0], [1], [0, 0, 1, 1], [], []>} : vector<16x256xbf16>, vector<256x128xbf16>, vector<16x128xf32> -> vector<16x128xf32>
    %210 = arith.mulf %191, %191 : vector<16x128xf32>
    %cst_90 = arith.constant dense<0.000000e+00> : vector<16xf32>
    %211 = vector.multi_reduction <add>, %210, %cst_90 [1] : vector<16x128xf32> to vector<16xf32>
    %212 = vector.shape_cast %211 : vector<16xf32> to vector<16x1xf32>
    %213 = math.rsqrt %212 : vector<16x1xf32>
    %214 = vector.broadcast %213 : vector<16x1xf32> to vector<16x128xf32>
    %215 = arith.mulf %191, %214 : vector<16x128xf32>
    %216 = arith.mulf %209, %209 : vector<16x128xf32>
    %cst_91 = arith.constant dense<0.000000e+00> : vector<16xf32>
    %217 = vector.multi_reduction <add>, %216, %cst_91 [1] : vector<16x128xf32> to vector<16xf32>
    %218 = vector.shape_cast %217 : vector<16xf32> to vector<16x1xf32>
    %219 = math.rsqrt %218 : vector<16x1xf32>
    %220 = vector.broadcast %219 : vector<16x1xf32> to vector<16x128xf32>
    %221 = arith.mulf %209, %220 : vector<16x128xf32>
    %c1_92 = arith.constant 1 : index
    %c0_93 = arith.constant 0 : index
    %c0_94 = arith.constant 0 : index
    %222 = vector.load %arg15[%c1_92, %c0_93, %c0_94] : memref<2x1x128xf32, #tpu.memory_space<vmem>>, vector<1x1x128xf32>
    %223 = vector.shape_cast %222 : vector<1x1x128xf32> to vector<1x128xf32>
    %224 = arith.subf %221, %215 : vector<16x128xf32>
    %225 = vector.broadcast %223 : vector<1x128xf32> to vector<16x128xf32>
    %226 = arith.mulf %225, %224 : vector<16x128xf32>
    %227 = arith.addf %215, %226 : vector<16x128xf32>
    %228 = arith.mulf %227, %227 : vector<16x128xf32>
    %cst_95 = arith.constant dense<0.000000e+00> : vector<16xf32>
    %229 = vector.multi_reduction <add>, %228, %cst_95 [1] : vector<16x128xf32> to vector<16xf32>
    %230 = vector.shape_cast %229 : vector<16xf32> to vector<16x1xf32>
    %231 = math.rsqrt %230 : vector<16x1xf32>
    %232 = vector.broadcast %231 : vector<16x1xf32> to vector<16x128xf32>
    %233 = arith.mulf %227, %232 : vector<16x128xf32>
    %c0_96 = arith.constant 0 : index
    %c0_97 = arith.constant 0 : index
    %234 = vector.load %arg16[%c0_96, %c0_97] : memref<16x128xf32, #tpu.memory_space<vmem>>, vector<16x128xf32>
    tpu.vector_store %arg16[%c0_96, %c0_97], %233 {strides = array<i32>} : memref<16x128xf32, #tpu.memory_space<vmem>>, vector<16x128xf32>,
    return
  }
}

</mosaic_0001>

<bundles_post_ra>
// kernel: tpu_custom_call.1
= control target key start
LH: loop header
LB: loop body
LE: loop exit
PB: predicated region body
PF: predicated region fallthrough
CT: control target
= control target key end

     0   :  { %s4316_s0 = inlined_call_operand.hbm [shape: f32[16,128], index: 0, kind: input, shape index: {}]   ;;  %s4317_s1 = inlined_call_operand.hbm [shape: f32[16,128], index: 1, kind: input, shape index: {}]   ;;  %s4318_s2 = inlined_call_operand.hbm [shape: f32[16,128], index: 2, kind: input, shape index: {}]   ;;  %s4319_s3 = inlined_call_operand.hbm [shape: bf16[128,128], index: 3, kind: input, shape index: {}]   ;;  %s4320_s4 = inlined_call_operand.hbm [shape: f32[64,128], index: 4, kind: input, shape index: {}]   ;;  %s4321_s5 = inlined_call_operand.hbm [shape: f32[64,128], index: 5, kind: input, shape index: {}]   ;;  %s4322_s6 = inlined_call_operand.hbm [shape: bf16[64,64], index: 6, kind: input, shape index: {}]   ;;  %s4323_s7 = inlined_call_operand.hbm [shape: f32[16,64], index: 7, kind: input, shape index: {}]   ;;  %s4324_s8 = inlined_call_operand.hbm [shape: bf16[2,128,384], index: 8, kind: input, shape index: {}]   ;;  %s4325_s9 = inlined_call_operand.hbm [shape: bf16[2,128,128], index: 9, kind: input, shape index: {}]   ;;  %s4326_s10 = inlined_call_operand.hbm [shape: bf16[2,128,256], index: 10, kind: input, shape index: {}]   ;;  %s4327_s11 = inlined_call_operand.hbm [shape: bf16[2,256,128], index: 11, kind: input, shape index: {}]   ;;  %s4328_s12 = inlined_call_operand.vmem [shape: f32[2,1,128], index: 12, kind: input, shape index: {}]   ;;  %s4329_s13 = inlined_call_operand.vmem [shape: f32[2,1,256], index: 13, kind: input, shape index: {}]   ;;  %s4330_s14 = inlined_call_operand.vmem [shape: f32[2,1,128], index: 14, kind: input, shape index: {}]   ;;  %s4331_s15 = inlined_call_operand.vmem [shape: f32[2,1,128], index: 15, kind: input, shape index: {}]   ;;  %s4332_s16 = inlined_call_operand.hbm [shape: f32[16,128], index: 16, kind: output, shape index: {}]  }
   0x1   :  { %4333 = sst [smem:[#allocation31_spill]] %s4316_s0 }
   0x2   :  { %21 = vsyncpa [#allocation3], 0 }
   0x3   :  { %22 = vsyncpa [#allocation6], 0 }
   0x4   :  { %23 = vsyncpa [#allocation9], 0 }
   0x5   :  { %24 = vsyncpa [#allocation12], 0 }
   0x6   :  { %25 = vsyncpa [#allocation15], 0 }
   0x7   :  { %26 = vsyncpa [#allocation18], 0 }
   0x8   :  { %27 = vsyncpa [#allocation21], 0 }
   0x9   :  { %28 = vsyncpa [#allocation4], 0  ;;  %s3747_s21 = smov [#allocation5]   ;;  %s3748_s23 = smov [#allocation8]  }
   0xa   :  { %s46_s22 = sshll.u32 %s3747_s21, 4  ;;  %s70_s24 = sshll.u32 %s3748_s23, 4  ;;  %s47_s22 = int_to_ptr.vmem [resolvable:$true] %s46_s22  ;;  %s71_s24 = int_to_ptr.vmem [resolvable:$true] %s70_s24 }
   0xb   :  { %s3479_s25 = scalar_lea.vmem %s47_s22, 256  ;;  %p3484_p1 = scmp.lt.s32.totalorder %s47_s22, %s47_s22 }
   0xc   :  { %p3480_p0 = scmp.ne.s32.totalorder %s47_s22, %s3479_s25  ;;  %p3485_p2 = scmp.lt.s32.totalorder %s3479_s25, %s3479_s25 }
   0xe   :  { %p3486_p3 = por %p3485_p2, %p3484_p1 }
  0x10   :  { %p3487_p4 = pnand %p3486_p3, %p3480_p0 }
  0x12   :  { %3490 = shalt.err (!%p3487_p4)
}
  0x13   :  { %s3749_s26 = smov 128   ;;  %s3750_s27 = smov 8  }
  0x14   :  { %52 = dma.hbm_to_vmem [thread:$0]  %s4317_s1, 256, %s47_s22, [#allocation6], %s3749_s26, %s3749_s26, %s3750_s27  }
  0x15   :  { %s3499_s30 = scalar_lea.vmem %s71_s24, 1024  ;;  %p3504_p6 = scmp.lt.s32.totalorder %s71_s24, %s71_s24 }
  0x16   :  { %p3500_p5 = scmp.ne.s32.totalorder %s71_s24, %s3499_s30  ;;  %p3505_p7 = scmp.lt.s32.totalorder %s3499_s30, %s3499_s30 }
  0x18   :  { %p3506_p8 = por %p3505_p7, %p3504_p6 }
  0x1a   :  { %p3507_p9 = pnand %p3506_p8, %p3500_p5 }
  0x1c   :  { %3510 = shalt.err (!%p3507_p9)
}
  0x1d   :  { %s3751_s0 = smov 64   ;;  %s3752_s17 = smov 4  }
  0x1e   :  { %76 = dma.hbm_to_vmem [thread:$0]  %s4319_s3, 1024, %s71_s24, [#allocation9], %s3751_s0, %s3751_s0, %s3752_s17  }
  0x1f   :  { %s3753_s20 = smov [#allocation11]   ;;  %s3754_s23 = smov [#allocation14]  }
  0x20   :  { %s94_s21 = sshll.u32 %s3753_s20, 4  ;;  %s118_s1 = sshll.u32 %s3754_s23, 4  ;;  %s95_s21 = int_to_ptr.vmem [resolvable:$true] %s94_s21  ;;  %s119_s1 = int_to_ptr.vmem [resolvable:$true] %s118_s1 }
  0x21   :  { %s3519_s22 = scalar_lea.vmem %s95_s21, 1024  ;;  %p3524_p11 = scmp.lt.s32.totalorder %s95_s21, %s95_s21 }
  0x22   :  { %p3520_p10 = scmp.ne.s32.totalorder %s95_s21, %s3519_s22  ;;  %p3525_p12 = scmp.lt.s32.totalorder %s3519_s22, %s3519_s22 }
  0x24   :  { %p3526_p13 = por %p3525_p12, %p3524_p11 }
  0x26   :  { %p3527_p0 = pnand %p3526_p13, %p3520_p10 }
  0x28   :  { %3530 = shalt.err (!%p3527_p0)
}
  0x29   :  { %100 = dma.hbm_to_vmem [thread:$0]  %s4321_s5, 1024, %s95_s21, [#allocation12], %s3749_s26, %s3749_s26, %s3750_s27  }
  0x2a   :  { %s3539_s3 = scalar_lea.vmem %s119_s1, 256  ;;  %p3544_p2 = scmp.lt.s32.totalorder %s119_s1, %s119_s1 }
  0x2b   :  { %p3540_p1 = scmp.ne.s32.totalorder %s119_s1, %s3539_s3  ;;  %p3545_p3 = scmp.lt.s32.totalorder %s3539_s3, %s3539_s3 }
  0x2d   :  { %p3546_p4 = por %p3545_p3, %p3544_p2 }
  0x2f   :  { %p3547_p5 = pnand %p3546_p4, %p3540_p1 }
  0x31   :  { %3550 = shalt.err (!%p3547_p5)
}
  0x32   :  { %124 = dma.hbm_to_vmem [thread:$0]  %s4323_s7, 256, %s119_s1, [#allocation15], %s3749_s26, %s3749_s26, %s3750_s27  }
  0x33   :  { %s3755_s30 = smov [#allocation17]   ;;  %s3756_s19 = smov [#allocation2]  }
  0x34   :  { %s142_s18 = sshll.u32 %s3755_s30, 4  ;;  %s34_s20 = sshll.u32 %s3756_s19, 4  ;;  %s143_s18 = int_to_ptr.vmem [resolvable:$true] %s142_s18  ;;  %s35_s20 = int_to_ptr.vmem [resolvable:$true] %s34_s20 }
  0x35   :  { %s3559_s5 = scalar_lea.vmem %s143_s18, 2048  ;;  %p3564_p7 = scmp.lt.s32.totalorder %s143_s18, %s143_s18 }
  0x36   :  { %p3560_p6 = scmp.ne.s32.totalorder %s143_s18, %s3559_s5  ;;  %p3565_p8 = scmp.lt.s32.totalorder %s3559_s5, %s3559_s5 }
  0x38   :  { %p3566_p9 = por %p3565_p8, %p3564_p7 }
  0x3a   :  { %p3567_p10 = pnand %p3566_p9, %p3560_p6 }
  0x3c   :  { %3570 = shalt.err (!%p3567_p10)
}
  0x3d   :  { %148 = dma.hbm_to_vmem [thread:$0]  %s4325_s9, 2048, %s143_s18, [#allocation18], %s3751_s0, %s3751_s0, %s3752_s17  }
  0x3e   :  { %s3579_s7 = scalar_lea.vmem %s35_s20, 256  ;;  %p3584_p12 = scmp.lt.s32.totalorder %s35_s20, %s35_s20 }
  0x3f   :  { %p3580_p11 = scmp.ne.s32.totalorder %s35_s20, %s3579_s7  ;;  %p3585_p13 = scmp.lt.s32.totalorder %s3579_s7, %s3579_s7 }
  0x41   :  { %p3586_p0 = por %p3585_p13, %p3584_p12 }
  0x43   :  { %p3587_p1 = pnand %p3586_p0, %p3580_p11 }
  0x45   :  { %3590 = shalt.err (!%p3587_p1)
}
  0x46   :  { %s4334_s25 = sld [smem:[#allocation31_spill]]  ;;  %s3757_s28 = smov [#allocation7]  }
  0x47   :  { %s58_s3 = sshll.u32 %s3757_s28, 4  ;;  %s3758_s24 = smov [#allocation10]   ;;  %s59_s3 = int_to_ptr.vmem [resolvable:$true] %s58_s3 }
  0x48   :  { %s82_s29 = sshll.u32 %s3758_s24, 4  ;;  %s3599_s9 = scalar_lea.vmem %s59_s3, 256  ;;  %s83_s29 = int_to_ptr.vmem [resolvable:$true] %s82_s29 }
  0x49   :  { %p3600_p2 = scmp.ne.s32.totalorder %s59_s3, %s3599_s9  ;;  %p3604_p3 = scmp.lt.s32.totalorder %s59_s3, %s59_s3 }
  0x4a   :  { %p3605_p4 = scmp.lt.s32.totalorder %s3599_s9, %s3599_s9 }
  0x4c   :  { %40 = dma.hbm_to_vmem [thread:$0]  %s4334_s25, 256, %s35_s20, [#allocation3], %s3749_s26, %s3749_s26, %s3750_s27  }
  0x4d   :  { %p3606_p5 = por %p3605_p4, %p3604_p3 }
  0x4f   :  { %p3607_p6 = pnand %p3606_p5, %p3600_p2 }
  0x51   :  { %3610 = shalt.err (!%p3607_p6)
}
  0x52   :  { %64 = dma.hbm_to_vmem [thread:$0]  %s4318_s2, 256, %s59_s3, [#allocation6], %s3749_s26, %s3749_s26, %s3750_s27  }
  0x53   :  { %s3619_s19 = scalar_lea.vmem %s83_s29, 1024  ;;  %p3624_p8 = scmp.lt.s32.totalorder %s83_s29, %s83_s29 }
  0x54   :  { %p3620_p7 = scmp.ne.s32.totalorder %s83_s29, %s3619_s19  ;;  %p3625_p9 = scmp.lt.s32.totalorder %s3619_s19, %s3619_s19 }
  0x56   :  { %p3626_p10 = por %p3625_p9, %p3624_p8 }
  0x58   :  { %p3627_p11 = pnand %p3626_p10, %p3620_p7 }
  0x5a   :  { %3630 = shalt.err (!%p3627_p11)
}
  0x5b   :  { %88 = dma.hbm_to_vmem [thread:$0]  %s4320_s4, 1024, %s83_s29, [#allocation9], %s3749_s26, %s3749_s26, %s3750_s27  }
  0x5c   :  { %s3759_s21 = smov [#allocation13]   ;;  %s3760_s7 = smov [#allocation16]  }
  0x5d   :  { %s106_s23 = sshll.u32 %s3759_s21, 4  ;;  %s130_s1 = sshll.u32 %s3760_s7, 4  ;;  %s107_s23 = int_to_ptr.vmem [resolvable:$true] %s106_s23  ;;  %s131_s1 = int_to_ptr.vmem [resolvable:$true] %s130_s1 }
  0x5e   :  { %s3639_s2 = scalar_lea.vmem %s107_s23, 512  ;;  %p3644_p13 = scmp.lt.s32.totalorder %s107_s23, %s107_s23 }
  0x5f   :  { %p3640_p12 = scmp.ne.s32.totalorder %s107_s23, %s3639_s2  ;;  %p3645_p0 = scmp.lt.s32.totalorder %s3639_s2, %s3639_s2 }
  0x61   :  { %p3646_p1 = por %p3645_p0, %p3644_p13 }
  0x63   :  { %p3647_p2 = pnand %p3646_p1, %p3640_p12 }
  0x65   :  { %3650 = shalt.err (!%p3647_p2)
}
  0x66   :  { %112 = dma.hbm_to_vmem [thread:$0]  %s4322_s6, 512, %s107_s23, [#allocation12], %s3751_s0, %s3751_s0, %s3752_s17  }
  0x67   :  { %s3659_s4 = scalar_lea.vmem %s131_s1, 6144  ;;  %p3664_p4 = scmp.lt.s32.totalorder %s131_s1, %s131_s1 }
  0x68   :  { %p3660_p3 = scmp.ne.s32.totalorder %s131_s1, %s3659_s4  ;;  %p3665_p5 = scmp.lt.s32.totalorder %s3659_s4, %s3659_s4 }
  0x6a   :  { %p3666_p6 = por %p3665_p5, %p3664_p4 }
  0x6c   :  { %p3667_p7 = pnand %p3666_p6, %p3660_p3 }
  0x6e   :  { %3670 = shalt.err (!%p3667_p7)
}
  0x6f   :  { %s3761_s28 = smov 192   ;;  %s3762_s3 = smov 12  }
  0x70   :  { %136 = dma.hbm_to_vmem [thread:$0]  %s4324_s8, 6144, %s131_s1, [#allocation15], %s3761_s28, %s3761_s28, %s3762_s3  }
  0x71   :  { %s3763_s9 = smov [#allocation19]   ;;  %s3764_s18 = smov [#allocation20]  }
  0x72   :  { %s154_s30 = sshll.u32 %s3763_s9, 4  ;;  %s166_s19 = sshll.u32 %s3764_s18, 4  ;;  %s155_s30 = int_to_ptr.vmem [resolvable:$true] %s154_s30  ;;  %s167_s19 = int_to_ptr.vmem [resolvable:$true] %s166_s19 }
  0x73   :  { %s3679_s6 = scalar_lea.vmem %s155_s30, 4096  ;;  %p3684_p9 = scmp.lt.s32.totalorder %s155_s30, %s155_s30 }
  0x74   :  { %p3680_p8 = scmp.ne.s32.totalorder %s155_s30, %s3679_s6  ;;  %p3685_p10 = scmp.lt.s32.totalorder %s3679_s6, %s3679_s6 }
  0x76   :  { %p3686_p11 = por %p3685_p10, %p3684_p9 }
  0x78   :  { %p3687_p12 = pnand %p3686_p11, %p3680_p8 }
  0x7a   :  { %3690 = shalt.err (!%p3687_p12)
}
  0x7b   :  { %160 = dma.hbm_to_vmem [thread:$0]  %s4326_s10, 4096, %s155_s30, [#allocation18], %s3749_s26, %s3749_s26, %s3750_s27  }
  0x7c   :  { %s3699_s8 = scalar_lea.vmem %s167_s19, 4096  ;;  %p3704_p0 = scmp.lt.s32.totalorder %s167_s19, %s167_s19 }
  0x7d   :  { %p3700_p13 = scmp.ne.s32.totalorder %s167_s19, %s3699_s8  ;;  %p3705_p1 = scmp.lt.s32.totalorder %s3699_s8, %s3699_s8 }
  0x7f   :  { %p3706_p2 = por %p3705_p1, %p3704_p0 }
  0x81   :  { %p3707_p3 = pnand %p3706_p2, %p3700_p13 }
  0x83   :  { %3710 = shalt.err (!%p3707_p3)
}
  0x84   :  { %172 = dma.hbm_to_vmem [thread:$0]  %s4327_s11, 4096, %s167_s19, [#allocation21], %s3751_s0, %s3751_s0, %s3752_s17  }
  0x85   :  { %3731 = dma.done.wait [#allocation3], 256  }
  0x86   :  { %3732 = vsyncadd [#allocation3], 4294967040 }
  0x87   :  { %3733 = dma.done.wait [#allocation6], 512  }
  0x88   :  { %3734 = vsyncadd [#allocation6], 4294966784 }
  0x89   :  { %3735 = dma.done.wait [#allocation9], 2048  }
  0x8a   :  { %3736 = vsyncadd [#allocation9], 4294965248 }
  0x8b   :  { %3737 = dma.done.wait [#allocation12], 1536  }
  0x8c   :  { %3738 = vsyncadd [#allocation12], 4294965760 }
  0x8d   :  { %3739 = dma.done.wait [#allocation15], 6400  }
  0x8e   :  { %3740 = vsyncadd [#allocation15], 4294960896 }
  0x8f   :  { %3741 = dma.done.wait [#allocation18], 6144  }
  0x90   :  { %3742 = vsyncadd [#allocation18], 4294961152 }
  0x91   :  { %3743 = dma.done.wait [#allocation21], 4096  }
  0x92   :  { %3744 = vsyncadd [#allocation21], 4294963200  ;;  %v3765_v0 = vmov 0   ;;  %v3178_v1 = vld [vmem:[#allocation16 + $0xac] ss:$12 sps:$4 sm:$0xff]   ;;  %v3924_v17 = vld [vmem:[#allocation2] sm:$0xff] }
  0x93   :  { %459 = vmatprep.mubr.bf16.mxu0 %v3765_v0  ;;  %v3180_v2 = vld [vmem:[#allocation16 + $0xa8] ss:$12 sps:$4 sm:$0xff]   ;;  %427 = vmatprep.subr.bf16.mxu0 %v3178_v1  ;;  %v3183_v4 = vld [vmem:[#allocation16 + $0x90] ss:$12 sps:$4 sm:$0xff]   ;;  %v3186_v6 = vld [vmem:[#allocation16 + $0x78] ss:$12 sps:$4 sm:$0xff]  }
  0x94   :  { %v3181_v3 = vld [vmem:[#allocation16 + $0x94] ss:$12 sps:$4 sm:$0xff]   ;;  %428 = vmatpush1.bf16.msra.mxu0 %v3180_v2  ;;  %v3184_v5 = vld [vmem:[#allocation16 + $0x7c] ss:$12 sps:$4 sm:$0xff]   ;;  %v3187_v7 = vld [vmem:[#allocation16 + $0x64] ss:$12 sps:$4 sm:$0xff]  }
  0x95   :  { %429 = vmatprep.subr.bf16.mxu0 %v3181_v3  ;;  %v3189_v8 = vld [vmem:[#allocation16 + $0x60] ss:$12 sps:$4 sm:$0xff]   ;;  %v3192_v10 = vld [vmem:[#allocation16 + $0x48] ss:$12 sps:$4 sm:$0xff]   ;;  %v3195_v12 = vld [vmem:[#allocation16 + $0x30] ss:$12 sps:$4 sm:$0xff]  }
  0x96   :  { %v3190_v9 = vld [vmem:[#allocation16 + $0x4c] ss:$12 sps:$4 sm:$0xff]   ;;  %v3193_v11 = vld [vmem:[#allocation16 + $0x34] ss:$12 sps:$4 sm:$0xff]   ;;  %v3196_v13 = vld [vmem:[#allocation16 + $0x1c] ss:$12 sps:$4 sm:$0xff]  }
  0x97   :  { %v3198_v14 = vld [vmem:[#allocation16 + $0x18] ss:$12 sps:$4 sm:$0xff]   ;;  %v3201_v16 = vld [vmem:[#allocation16] ss:$12 sps:$4 sm:$0xff]   ;;  %v3202_v20 = vld [vmem:[#allocation16 + $0xb0] ss:$12 sps:$4 sm:$0xff]  }
  0x98   :  { %430 = vmatpush1.bf16.msra.mxu0 %v3183_v4  ;;  %v3199_v15 = vld [vmem:[#allocation16 + $0x4] ss:$12 sps:$4 sm:$0xff]   ;;  %v3926_v18 = vld [vmem:[#allocation2 + $0x8] sm:$0xff]  ;;  %v3766_v21 = vmov 0.0   ;;  %vm3767_vm0 = vmmov 0   ;;  %v3212_v26 = vld [vmem:[#allocation8 + $0x28] sm:$0xff]  }
  0x99   :  { %431 = vmatprep.subr.bf16.mxu0 %v3184_v5  ;;  %v266_v19 = vpack.c.bf16 %v3926_v18, %v3924_v17  ;;  %2910 = vmatprep.subr.bf16.mxu1 %v3766_v21  ;;  %v3203_v22 = vld [vmem:[#allocation16 + $0x98] ss:$12 sps:$4 sm:$0xff]   ;;  %v3210_v23 = vld [vmem:[#allocation8 + $0x38] sm:$0xff]   ;;  %v3213_v28 = vld [vmem:[#allocation8 + $0x20] sm:$0xff]   ;;  %vm796_vm1 = vcmask 523264  }
  0x9a   :  { %2926 = vmatprep.mubr.msk.bf16.mxu1 %vm3767_vm0, %v3766_v21  ;;  %2911 = vmatpush3.bf16.msra.mxu1 %v3202_v20  ;;  %v3211_v24 = vld [vmem:[#allocation8 + $0x30] sm:$0xff]   ;;  %v3205_v27 = vld [vmem:[#allocation16 + $0x68] ss:$12 sps:$4 sm:$0xff]   ;;  %v3206_v29 = vld [vmem:[#allocation16 + $0x50] ss:$12 sps:$4 sm:$0xff]  }
  0x9b   :  { %2912 = vmatprep.subr.bf16.mxu1 %v3766_v21  ;;  %v3204_v25 = vld [vmem:[#allocation16 + $0x80] ss:$12 sps:$4 sm:$0xff]   ;;  %v3207_v31 = vld [vmem:[#allocation16 + $0x38] ss:$12 sps:$4 sm:$0xff]   ;;  %v3209_v33 = vld [vmem:[#allocation16 + $0x8] ss:$12 sps:$4 sm:$0xff]  }
  0x9c   :  { %432 = vmatpush1.bf16.msra.mxu0 %v3186_v6  ;;  %v3214_v30 = vld [vmem:[#allocation8 + $0x18] sm:$0xff]   ;;  %v3956_v34 = vld [vmem:[#allocation8 + $0x10] sm:$0xff]   ;;  %v3962_v35 = vld [vmem:[#allocation8 + $0x8] sm:$0xff]  }
  0x9d   :  { %433 = vmatprep.subr.bf16.mxu0 %v3187_v7  ;;  %v3208_v32 = vld [vmem:[#allocation16 + $0x20] ss:$12 sps:$4 sm:$0xff]   ;;  %v3968_v36 = vld [vmem:[#allocation8] sm:$0xff]   ;;  %v221_v49 = vld [vmem:[#allocation5 + $0x8] sm:$0xff] }
  0x9e   :  { %2913 = vmatpush3.bf16.msra.mxu1 %v3203_v22  ;;  %v222_v45 = vld [vmem:[#allocation7] sm:$0xff]  ;;  %v220_v46 = vld [vmem:[#allocation5] sm:$0xff]  ;;  %v223_v51 = vld [vmem:[#allocation7 + $0x8] sm:$0xff] }
  0x9f   :  { %2914 = vmatprep.subr.bf16.mxu1 %v3766_v21 }
  0xa0   :  { %434 = vmatpush1.bf16.msra.mxu0 %v3189_v8  ;;  %v3983_v8 = vld [vmem:[#allocation11] sm:$0xff] }
  0xa1   :  { %435 = vmatprep.subr.bf16.mxu0 %v3190_v9  ;;  %v3985_v9 = vld [vmem:[#allocation11 + $0x10] sm:$0xff] }
  0xa2   :  { %2915 = vmatpush3.bf16.msra.mxu1 %v3204_v25 }
  0xa3   :  { %2916 = vmatprep.subr.bf16.mxu1 %v3766_v21 }
  0xa4   :  { %436 = vmatpush1.bf16.msra.mxu0 %v3192_v10  ;;  %v3987_v10 = vld [vmem:[#allocation11 + $0x20] sm:$0xff] }
  0xa5   :  { %437 = vmatprep.subr.bf16.mxu0 %v3193_v11  ;;  %v3989_v11 = vld [vmem:[#allocation11 + $0x30] sm:$0xff] }
  0xa6   :  { %2917 = vmatpush3.bf16.msra.mxu1 %v3205_v27 }
  0xa7   :  { %2918 = vmatprep.subr.bf16.mxu1 %v3766_v21 }
  0xa8   :  { %438 = vmatpush1.bf16.msra.mxu0 %v3195_v12  ;;  %v3991_v12 = vld [vmem:[#allocation11 + $0x8] sm:$0xff] }
  0xa9   :  { %439 = vmatprep.subr.bf16.mxu0 %v3196_v13  ;;  %v3993_v13 = vld [vmem:[#allocation11 + $0x18] sm:$0xff] }
  0xaa   :  { %2919 = vmatpush3.bf16.msra.mxu1 %v3206_v29 }
  0xab   :  { %2920 = vmatprep.subr.bf16.mxu1 %v3766_v21 }
  0xac   :  { %440 = vmatpush1.bf16.msra.mxu0 %v3198_v14  ;;  %v3995_v14 = vld [vmem:[#allocation11 + $0x28] sm:$0xff] }
  0xad   :  { %441 = vmatprep.subr.bf16.mxu0 %v3199_v15  ;;  %v3997_v15 = vld [vmem:[#allocation11 + $0x38] sm:$0xff] }
  0xae   :  { %2921 = vmatpush3.bf16.msra.mxu1 %v3207_v31 }
  0xaf   :  { %2922 = vmatprep.subr.bf16.mxu1 %v3766_v21 }
  0xb0   :  { %442 = vmatpush1.bf16.msra.mxu0 %v3201_v16 }
  0xb1   :  { %2930 = vmatprep.subr.bf16.mxu0 %v3766_v21 }
  0xb2   :  { %2923 = vmatpush3.bf16.msra.mxu1 %v3208_v32 }
  0xb3   :  { %460 = vmatmul.mubr.bf16.vlgmr.msra.gmra.mxu0 %v266_v19  ;;  %2924 = vmatprep.subr.bf16.mxu1 %v3766_v21 }
  0xb4   :  { %2946 = vmatprep.mubr.msk.bf16.mxu0 %vm3767_vm0, %v3766_v21  ;;  %2931 = vmatpush3.bf16.msra.mxu0 %v3210_v23 }
  0xb5   :  { %2932 = vmatprep.subr.bf16.mxu0 %v3766_v21 }
  0xb6   :  { %2925 = vmatpush3.bf16.msra.mxu1 %v3209_v33 }
  0xb7   :  { %2950 = vmatprep.subr.bf16.mxu1 %v3766_v21 }
  0xb8   :  { %2933 = vmatpush3.bf16.msra.mxu0 %v3211_v24 }
  0xb9   :  { %2934 = vmatprep.subr.bf16.mxu0 %v3766_v21  ;;  %2927 = vmatmul.mubr.bf16.vlgmr.msra.gmra.mxu1 %v266_v19 }
  0xba   :  { %2951 = vmatpush3.bf16.msra.mxu1 %v3210_v23  ;;  %2966 = vmatprep.mubr.msk.bf16.mxu1 %vm3767_vm0, %v3766_v21 }
  0xbb   :  { %2952 = vmatprep.subr.bf16.mxu1 %v3766_v21 }
  0xbc   :  { %2935 = vmatpush3.bf16.msra.mxu0 %v3212_v26 }
  0xbd   :  { %2936 = vmatprep.subr.bf16.mxu0 %v3766_v21 }
  0xbe   :  { %2953 = vmatpush3.bf16.msra.mxu1 %v3211_v24 }
  0xbf   :  { %2954 = vmatprep.subr.bf16.mxu1 %v3766_v21 }
  0xc0   :  { %2937 = vmatpush3.bf16.msra.mxu0 %v3213_v28 }
  0xc1   :  { %2938 = vmatprep.subr.bf16.mxu0 %v3766_v21 }
  0xc2   :  { %2955 = vmatpush3.bf16.msra.mxu1 %v3212_v26 }
  0xc3   :  { %2956 = vmatprep.subr.bf16.mxu1 %v3766_v21 }
  0xc4   :  { %2939 = vmatpush3.bf16.msra.mxu0 %v3214_v30 }
  0xc5   :  { %2940 = vmatprep.subr.bf16.mxu0 %v3766_v21 }
  0xc6   :  { %2957 = vmatpush3.bf16.msra.mxu1 %v3213_v28 }
  0xc7   :  { %2958 = vmatprep.subr.bf16.mxu1 %v3766_v21 }
  0xc8   :  { %2941 = vmatpush3.bf16.msra.mxu0 %v3956_v34 }
  0xc9   :  { %2942 = vmatprep.subr.bf16.mxu0 %v3766_v21 }
  0xca   :  { %2959 = vmatpush3.bf16.msra.mxu1 %v3214_v30 }
  0xcb   :  { %2960 = vmatprep.subr.bf16.mxu1 %v3766_v21 }
  0xcc   :  { %2943 = vmatpush3.bf16.msra.mxu0 %v3962_v35 }
  0xcd   :  { %2944 = vmatprep.subr.bf16.mxu0 %v3766_v21 }
  0xce   :  { %2961 = vmatpush3.bf16.msra.mxu1 %v3956_v34 }
  0xcf   :  { %2962 = vmatprep.subr.bf16.mxu1 %v3766_v21 }
  0xd0   :  { %2945 = vmatpush3.bf16.msra.mxu0 %v3968_v36 }
  0xd2   :  { %2963 = vmatpush3.bf16.msra.mxu1 %v3962_v35 }
  0xd3   :  { %2964 = vmatprep.subr.bf16.mxu1 %v3766_v21 }
  0xd6   :  { %2965 = vmatpush3.bf16.msra.mxu1 %v3968_v36 }
  0xd7   :  { %2989 = vmatprep.subr.bf16.mxu1 %v3766_v21 }
 0x173   :  { %v461_v37 = vpop.f32.mrf.mxu0 }
 0x174   :  { %513 = vrot.lane.b32.xlu1 %v461_v37, %s3751_s0  ;;  %v511_v52 = vmul.f32 %v461_v37, %v220_v46 }
 0x175   :  { %v463_v38 = vpop.f32.mrf.mxu0 }
 0x176   :  { %523 = vrot.lane.b32.xlu0 %v463_v38, %s3751_s0  ;;  %v521_v55 = vmul.f32 %v463_v38, %v220_v46 }
 0x177   :  { %v465_v39 = vpop.f32.mrf.mxu0 }
 0x178   :  { %515 = vrot.lane.b32.xlu1 %v465_v39, %s3751_s0  ;;  %v512_v56 = vmul.f32 %v465_v39, %v221_v49 }
 0x179   :  { %v467_v40 = vpop.f32.mrf.mxu0  ;;  %v504_v41 = vpop.f32.mrf.mxu1 }
 0x17a   :  { %525 = vrot.lane.b32.xlu0 %v467_v40, %s3751_s0  ;;  %v522_v60 = vmul.f32 %v467_v40, %v221_v49  ;;  %v4000_v16 = vmul.f32 %v504_v41, %v3983_v8  ;;  %v4003_v19 = vmul.f32 %v504_v41, %v3985_v9  ;;  %v4006_v20 = vmul.f32 %v504_v41, %v3987_v10 }
 0x17b   :  { %v2928_v42 = vpop.f32.mrf.mxu1  ;;  %v4009_v22 = vmul.f32 %v504_v41, %v3989_v11 }
 0x17d   :  { %v507_v43 = vpop.f32.mrf.mxu1 }
 0x17e   :  { %v4012_v23 = vmul.f32 %v507_v43, %v3991_v12  ;;  %v4015_v24 = vmul.f32 %v507_v43, %v3993_v13  ;;  %v4018_v25 = vmul.f32 %v507_v43, %v3995_v14  ;;  %v4021_v26 = vmul.f32 %v507_v43, %v3997_v15  ;;  %v2624_v43 = vld [vmem:[%s4328_s12] ss:$0 sm:$0xff] }
 0x17f   :  { %v2929_v44 = vpop.f32.mrf.mxu1 }
 0x180   :  { %v857_v27 = vpack.c.bf16 %v4021_v26, %v4009_v22  ;;  %v856_v28 = vpack.c.bf16 %v4018_v25, %v4006_v20  ;;  %v855_v29 = vpack.c.bf16 %v4015_v24, %v4003_v19  ;;  %v854_v30 = vpack.c.bf16 %v4012_v23, %v4000_v16  ;;  %v3222_v22 = vld [vmem:[#allocation17 + $0x38] sm:$0xff]   ;;  %v3223_v26 = vld [vmem:[#allocation17 + $0x30] sm:$0xff]   ;;  %v3224_v20 = vld [vmem:[#allocation17 + $0x28] sm:$0xff]  }
 0x181   :  { %v3225_v25 = vld [vmem:[#allocation17 + $0x20] sm:$0xff]   ;;  %v3226_v19 = vld [vmem:[#allocation17 + $0x18] sm:$0xff]   ;;  %v3227_v16 = vld [vmem:[#allocation17 + $0x10] sm:$0xff]  }
 0x1e6   :  { %v514_v47 = vpop.permute.xlu1 %513 }
 0x1e7   :  { %v517_v48 = vmul.f32 %v514_v47, %v222_v45 }
 0x1e8   :  { %v524_v50 = vpop.permute.xlu0 %523 }
 0x1e9   :  { %v527_v53 = vmul.f32 %v524_v50, %v222_v45  ;;  %v519_v57 = vadd.f32 %v517_v48, %v511_v52  ;;  %v4034_v48 = vld [vmem:[#allocation10 + $0x38] sm:$0xff] }
 0x1ea   :  { %v516_v54 = vpop.permute.xlu1 %515 }
 0x1eb   :  { %v518_v58 = vmul.f32 %v516_v54, %v223_v51  ;;  %v529_v61 = vadd.f32 %v527_v53, %v521_v55  ;;  %v531_v1 = vmul.f32 %v519_v57, %v519_v57  ;;  %v4040_v54 = vld [vmem:[#allocation10 + $0x28] sm:$0xff] }
 0x1ec   :  { %v526_v59 = vpop.permute.xlu0 %525 }
 0x1ed   :  { %v3977_v62 = vadd.f32 %v518_v58, %v512_v56  ;;  %v528_v63 = vmul.f32 %v526_v59, %v223_v51  ;;  %v636_v4 = vmul.f32 %v529_v61, %v529_v61  ;;  %v4036_v51 = vld [vmem:[#allocation10 + $0x30] sm:$0xff]  ;;  %v4043_v56 = vld [vmem:[#allocation10 + $0x20] sm:$0xff]  ;;  %v4046_v58 = vld [vmem:[#allocation10 + $0x18] sm:$0xff] }
 0x1ef   :  { %v532_v2 = vmul.f32 %v3977_v62, %v3977_v62  ;;  %v530_v3 = vadd.f32 %v528_v63, %v522_v60  ;;  %v4049_v60 = vld [vmem:[#allocation10 + $0x10] sm:$0xff]  ;;  %v4052_v63 = vld [vmem:[#allocation10 + $0x8] sm:$0xff] }
 0x1f1   :  { %v533_v5 = vpack.c.bf16 %v532_v2, %v531_v1  ;;  %v637_v6 = vmul.f32 %v530_v3, %v530_v3  ;;  %v4055_v2 = vld [vmem:[#allocation10] sm:$0xff] }
 0x1f3   :  { %v638_v7 = vpack.c.bf16 %v637_v6, %v636_v4  ;;  %2947 = vmatmul.mubr.bf16.vlgmr.msra.gmra.mxu0 %v533_v5 }
 0x1f5   :  { %2967 = vmatmul.mubr.bf16.vlgmr.msra.gmra.mxu1 %v638_v7  ;;  %v4062_v7 = vld [vmem:[#allocation13 + $0x18] sm:$0xff]  }
 0x1f6   :  { %2997 = vmatprep.mubr.msk.bf16.mxu1 %vm3767_vm0, %v3766_v21  ;;  %2990 = vmatpush3.bf16.msra.mxu1 %v4062_v7 }
 0x1f7   :  { %2991 = vmatprep.subr.bf16.mxu1 %v3766_v21 }
 0x2b3   :  { %v616_v31 = vpop.f32.mrf.mxu0 }
 0x2b4   :  { %3350 = vrsqrt.f32 %v616_v31  ;;  %v4065_v31 = vld [vmem:[#allocation13 + $0x10] sm:$0xff]  }
 0x2b5   :  { %v2948_v32 = vpop.f32.mrf.mxu0  ;;  %v673_v33 = vpop.f32.mrf.mxu1  ;;  %2992 = vmatpush3.bf16.msra.mxu1 %v4065_v31 }
 0x2b6   :  { %3352 = vrsqrt.f32 %v673_v33  ;;  %2993 = vmatprep.subr.bf16.mxu1 %v3766_v21  ;;  %v4073_v32 = vld [vmem:[#allocation13] sm:$0xff]   ;;  %v4078_v33 = vld [vmem:[#allocation14 + $0x8] sm:$0xff] }
 0x2b7   :  { %v619_v37 = vpop.f32.mrf.mxu0  ;;  %v2968_v38 = vpop.f32.mrf.mxu1 }
 0x2b8   :  { %v4080_v38 = vld [vmem:[#allocation14] sm:$0xff] }
 0x2b9   :  { %v2949_v39 = vpop.f32.mrf.mxu0  ;;  %v676_v40 = vpop.f32.mrf.mxu1 }
 0x2ba   :  { %3354 = vrsqrt.f32 %v676_v40 }
 0x2bb   :  { %v2969_v41 = vpop.f32.mrf.mxu1  ;;  %3356 = vrsqrt.f32 %v619_v37 }
 0x2c1   :  { %v3351_v42 = vpop.eup %3350 }
 0x2c2   :  { %v625_v44 = vmul.f32 %v3351_v42, %v519_v57 }
 0x2c3   :  { %v3353_v46 = vpop.eup %3352 }
 0x2c4   :  { %v634_v45 = vmul.f32 %v2624_v43, %v625_v44  ;;  %v682_v50 = vmul.f32 %v3353_v46, %v529_v61 }
 0x2c6   :  { %2986 = vmatprep.mubr.f32.mxu0 %v634_v45  ;;  %v690_v53 = vmul.f32 %v682_v50, %v4036_v51  ;;  %v688_v57 = vmul.f32 %v682_v50, %v4043_v56  ;;  %v686_v61 = vmul.f32 %v682_v50, %v4049_v60  ;;  %v684_v4 = vmul.f32 %v682_v50, %v4055_v2 }
 0x2c7   :  { %v3355_v47 = vpop.eup %3354 }
 0x2c8   :  { %v683_v49 = vmul.f32 %v3355_v47, %v530_v3  ;;  %v3357_v3 = vpop.eup %3356 }
 0x2c9   :  { %v626_v5 = vmul.f32 %v3357_v3, %v3977_v62  ;;  %v4069_v62 = vld [vmem:[#allocation13 + $0x8] sm:$0xff]  }
 0x2ca   :  { %v691_v52 = vmul.f32 %v683_v49, %v4034_v48  ;;  %v689_v55 = vmul.f32 %v683_v49, %v4040_v54  ;;  %v687_v59 = vmul.f32 %v683_v49, %v4046_v58  ;;  %v685_v1 = vmul.f32 %v683_v49, %v4052_v63  ;;  %2994 = vmatpush3.bf16.msra.mxu1 %v4069_v62 }
 0x2cb   :  { %v635_v6 = vmul.f32 %v2624_v43, %v626_v5  ;;  %2995 = vmatprep.subr.bf16.mxu1 %v3766_v21 }
 0x2cc   :  { %2970 = vmatprep.subr.mxu0 %v691_v52 }
 0x2cd   :  { %2971 = vmatpush3.xpose.msra.mxu0 %v691_v52  ;;  %v3228_v52 = vld [vmem:[#allocation17 + $0x8] sm:$0xff]  }
 0x2ce   :  { %2972 = vmatprep.subr.mxu0 %v690_v53  ;;  %2996 = vmatpush3.bf16.msra.mxu1 %v4073_v32 }
 0x2cf   :  { %3001 = vmatprep.subr.bf16.mxu1 %v3766_v21 }
 0x2d1   :  { %2973 = vmatpush3.xpose.msra.mxu0 %v690_v53  ;;  %v3229_v53 = vld [vmem:[#allocation17] sm:$0xff]  }
 0x2d2   :  { %2974 = vmatprep.subr.mxu0 %v689_v55 }
 0x2d5   :  { %2975 = vmatpush3.xpose.msra.mxu0 %v689_v55  ;;  %v1008_v55 = vmul.f32 %v3924_v17, %v3924_v17 }
 0x2d6   :  { %2976 = vmatprep.subr.mxu0 %v688_v57 }
 0x2d7   :  { %1010 = vadd.xlane.f32.xlu0 %v1008_v55 }
 0x2d9   :  { %2977 = vmatpush3.xpose.msra.mxu0 %v688_v57 }
 0x2da   :  { %2978 = vmatprep.subr.mxu0 %v687_v59 }
 0x2dd   :  { %2979 = vmatpush3.xpose.msra.mxu0 %v687_v59 }
 0x2de   :  { %2980 = vmatprep.subr.mxu0 %v686_v61 }
 0x2e1   :  { %2981 = vmatpush3.xpose.msra.mxu0 %v686_v61 }
 0x2e2   :  { %2982 = vmatprep.subr.mxu0 %v685_v1 }
 0x2e5   :  { %2983 = vmatpush3.xpose.msra.mxu0 %v685_v1 }
 0x2e6   :  { %2984 = vmatprep.subr.mxu0 %v684_v4 }
 0x2e9   :  { %2985 = vmatpush3.xpose.msra.mxu0 %v684_v4  ;;  %v1009_v4 = vmul.f32 %v3926_v18, %v3926_v18 }
 0x2ea   :  { %3013 = vmatprep.subr.bf16.mxu0 %v3766_v21 }
 0x2eb   :  { %1012 = vadd.xlane.f32.xlu1 %v1009_v4  ;;  %v3242_v4 = vld [vmem:[#allocation19 + $0x30] ss:$8 sps:$4 sm:$0xff]  }
 0x2ec   :  { %2987 = vmatmul.mubr.f32.vlgmr.msra.gmra.mxu0 %v635_v6 }
 0x2ed   :  { %3029 = vmatprep.mubr.msk.bf16.mxu0 %vm3767_vm0, %v3766_v21  ;;  %3014 = vmatpush3.bf16.msra.mxu0 %v3222_v22  ;;  %v3236_v22 = vld [vmem:[#allocation19 + $0x50] ss:$8 sps:$4 sm:$0xff]  }
 0x2ee   :  { %3015 = vmatprep.subr.bf16.mxu0 %v3766_v21 }
 0x2f1   :  { %3016 = vmatpush3.bf16.msra.mxu0 %v3223_v26 }
 0x2f2   :  { %3017 = vmatprep.subr.bf16.mxu0 %v3766_v21 }
 0x2f5   :  { %3018 = vmatpush3.bf16.msra.mxu0 %v3224_v20 }
 0x2f6   :  { %3019 = vmatprep.subr.bf16.mxu0 %v3766_v21 }
 0x2f9   :  { %3020 = vmatpush3.bf16.msra.mxu0 %v3225_v25 }
 0x2fa   :  { %3021 = vmatprep.subr.bf16.mxu0 %v3766_v21 }
 0x2fd   :  { %3022 = vmatpush3.bf16.msra.mxu0 %v3226_v19 }
 0x2fe   :  { %3023 = vmatprep.subr.bf16.mxu0 %v3766_v21 }
 0x301   :  { %3024 = vmatpush3.bf16.msra.mxu0 %v3227_v16 }
 0x302   :  { %3025 = vmatprep.subr.bf16.mxu0 %v3766_v21 }
 0x305   :  { %3026 = vmatpush3.bf16.msra.mxu0 %v3228_v52 }
 0x306   :  { %3027 = vmatprep.subr.bf16.mxu0 %v3766_v21 }
 0x309   :  { %3028 = vmatpush3.bf16.msra.mxu0 %v3229_v53 }
 0x360   :  { %v1011_v26 = vpop.xlane.xlu0 %1010 }
 0x374   :  { %v1013_v20 = vpop.xlane.xlu1 %1012 }
 0x3ac   :  { %v2988_v37 = vpop.f32.mrf.mxu0 }
 0x3ad   :  { %v764_v39 = vadd.f32 %v2988_v37, %v4078_v33 }
 0x3ae   :  { %v758_v40 = vpop.f32.mrf.mxu0 }
 0x3af   :  { %v769_v41 = vmul.f32 1.442695, %v764_v39  ;;  %v759_v42 = vadd.f32 %v758_v40, %v4080_v38 }
 0x3b1   :  { %v767_v43 = vmul.f32 1.442695, %v759_v42  ;;  %3358 = vpow2.f32 %v769_v41  ;;  %v3230_v42 = vld [vmem:[#allocation19 + $0x70] ss:$8 sps:$4 sm:$0xff]  }
 0x3b3   :  { %3360 = vpow2.f32 %v767_v43  ;;  %v3232_v43 = vld [vmem:[#allocation19 + $0x74] ss:$8 sps:$4 sm:$0xff]  }
 0x3be   :  { %v3359_v44 = vpop.eup %3358 }
 0x3c0   :  { %v3361_v45 = vpop.eup %3360 }
 0x3c1   :  { %v771_v46 = vpack.c.bf16 %v3359_v44, %v3361_v45 }
 0x3c3   :  { %2998 = vmatmul.mubr.msk.bf16.vlgmr.msra.gmra.mxu1 %vm796_vm1, %v771_v46  ;;  %v3238_v46 = vld [vmem:[#allocation19 + $0x54] ss:$8 sps:$4 sm:$0xff]  }
 0x3c4   :  { %3002 = vmatpush3.bf16.msra.mxu1 %v857_v27  ;;  %3009 = vmatprep.mubr.msk.bf16.mxu1 %vm3767_vm0, %v3766_v21 }
 0x3c5   :  { %3003 = vmatprep.subr.bf16.mxu1 %v3766_v21 }
 0x3c8   :  { %3004 = vmatpush3.bf16.msra.mxu1 %v856_v28 }
 0x3c9   :  { %3005 = vmatprep.subr.bf16.mxu1 %v3766_v21 }
 0x3cc   :  { %3006 = vmatpush3.bf16.msra.mxu1 %v855_v29 }
 0x3cd   :  { %3007 = vmatprep.subr.bf16.mxu1 %v3766_v21 }
 0x3d0   :  { %3008 = vmatpush3.bf16.msra.mxu1 %v854_v30 }
 0x3d1   :  { %1148 = vmatprep.subr.bf16.mxu1 %v3232_v43 }
 0x483   :  { %v834_v23 = vpop.f32.mrf.mxu1 }
 0x484   :  { %3362 = vrcp.f32 %v834_v23 }
 0x485   :  { %v2999_v24 = vpop.f32.mrf.mxu1 }
 0x487   :  { %v837_v27 = vpop.f32.mrf.mxu1 }
 0x488   :  { %3364 = vrcp.f32 %v837_v27 }
 0x489   :  { %v3000_v28 = vpop.f32.mrf.mxu1  ;;  %3366 = vrsqrt.f32 %v1011_v26 }
 0x48a   :  { %3368 = vrsqrt.f32 %v1013_v20 }
 0x491   :  { %v3363_v29 = vpop.eup %3362 }
 0x492   :  { %v843_v47 = vmul.f32 %v3363_v29, %v3361_v45  ;;  %v3233_v45 = vld [vmem:[#allocation19 + $0x60] ss:$8 sps:$4 sm:$0xff]  }
 0x493   :  { %v2639_v29 = vld [vmem:[%s4330_s14] ss:$0 sm:$0xff] }
 0x495   :  { %v3365_v30 = vpop.eup %3364 }
 0x496   :  { %v844_v49 = vmul.f32 %v3365_v30, %v3359_v44  ;;  %v3235_v44 = vld [vmem:[#allocation19 + $0x64] ss:$8 sps:$4 sm:$0xff]   ;;  %v3367_v16 = vpop.eup %3366 }
 0x497   :  { %v3369_v23 = vpop.eup %3368  ;;  %v1016_v27 = vmul.f32 %v3367_v16, %v3924_v17  ;;  %v3239_v17 = vld [vmem:[#allocation19 + $0x40] ss:$8 sps:$4 sm:$0xff]   ;;  %v3255_v16 = vld [vmem:[#allocation20 + $0x38] sm:$0xff]  }
 0x498   :  { %v853_v50 = vpack.c.bf16 %v844_v49, %v843_v47  ;;  %v1017_v47 = vmul.f32 %v3369_v23, %v3926_v18  ;;  %v3245_v18 = vld [vmem:[#allocation19 + $0x20] ss:$8 sps:$4 sm:$0xff]   ;;  %v3256_v23 = vld [vmem:[#allocation20 + $0x70] sm:$0xff]  }
 0x49a   :  { %3010 = vmatmul.mubr.msk.bf16.vlgmr.msra.gmra.mxu1 %vm796_vm1, %v853_v50 }
 0x49b   :  { %1180 = vmatprep.mubr.bf16.mxu1 %v3765_v0  ;;  %1149 = vmatpush1.bf16.msra.mxu1 %v3230_v42 }
 0x49c   :  { %1150 = vmatprep.subr.bf16.mxu1 %v3235_v44 }
 0x49f   :  { %1151 = vmatpush1.bf16.msra.mxu1 %v3233_v45 }
 0x4a0   :  { %1152 = vmatprep.subr.bf16.mxu1 %v3238_v46 }
 0x4a3   :  { %1153 = vmatpush1.bf16.msra.mxu1 %v3236_v22 }
 0x55a   :  { %v895_v57 = vpop.f32.mrf.mxu1 }
 0x55c   :  { %v3011_v59 = vpop.f32.mrf.mxu1 }
 0x55e   :  { %v898_v61 = vpop.f32.mrf.mxu1 }
 0x55f   :  { %v902_v1 = vpack.c.bf16 %v898_v61, %v895_v57 }
 0x560   :  { %v3012_v3 = vpop.f32.mrf.mxu1 }
 0x561   :  { %3030 = vmatmul.mubr.bf16.vlgmr.msra.gmra.mxu0 %v902_v1  ;;  %v3241_v3 = vld [vmem:[#allocation19 + $0x44] ss:$8 sps:$4 sm:$0xff]  }
 0x562   :  { %1154 = vmatprep.subr.bf16.mxu1 %v3241_v3  ;;  %v1191_v3 = vld [vmem:[%s4329_s13] sm:$0x3] }
 0x563   :  { %1155 = vmatpush1.bf16.msra.mxu1 %v3239_v17 }
 0x621   :  { %v1001_v5 = vpop.f32.mrf.mxu0 }
 0x622   :  { %v1018_v6 = vmul.f32 %v1001_v5, %v1001_v5 }
 0x623   :  { %v3031_v37 = vpop.f32.mrf.mxu0 }
 0x624   :  { %1020 = vadd.xlane.f32.xlu0 %v1018_v6  ;;  %v3247_v6 = vld [vmem:[#allocation19 + $0x24] ss:$8 sps:$4 sm:$0xff]   ;;  %v3250_v37 = vld [vmem:[#allocation19 + $0x14] ss:$8 sps:$4 sm:$0xff]  }
 0x625   :  { %v1004_v39 = vpop.f32.mrf.mxu0 }
 0x626   :  { %v1019_v40 = vmul.f32 %v1004_v39, %v1004_v39 }
 0x627   :  { %v3032_v41 = vpop.f32.mrf.mxu0 }
 0x628   :  { %1022 = vadd.xlane.f32.xlu0 %v1019_v40  ;;  %v3253_v40 = vld [vmem:[#allocation19 + $0x4] ss:$8 sps:$4 sm:$0xff]   ;;  %v3251_v41 = vld [vmem:[#allocation19] ss:$8 sps:$4 sm:$0xff]  }
 0x6ad   :  { %v1021_v25 = vpop.xlane.xlu0 %1020 }
 0x6ae   :  { %3370 = vrsqrt.f32 %v1021_v25 }
 0x6b1   :  { %v1023_v19 = vpop.xlane.xlu0 %1022 }
 0x6b2   :  { %3372 = vrsqrt.f32 %v1023_v19  ;;  %v3254_v19 = vld [vmem:[#allocation20 + $0x78] sm:$0xff]  }
 0x6b3   :  { %2810 = vmatprep.subr.bf16.mxu0 %v3254_v19 }
 0x6b4   :  { %2811 = vmatpush3.bf16.msra.mxu0 %v3255_v16 }
 0x6b5   :  { %2812 = vmatprep.subr.bf16.mxu0 %v3256_v23 }
 0x6bb   :  { %v3371_v24 = vpop.eup %3370 }
 0x6bc   :  { %v1026_v28 = vmul.f32 %v3371_v24, %v1001_v5  ;;  %v3244_v5 = vld [vmem:[#allocation19 + $0x34] ss:$8 sps:$4 sm:$0xff]  }
 0x6bd   :  { %1156 = vmatprep.subr.bf16.mxu1 %v3244_v5  ;;  %v3257_v24 = vld [vmem:[#allocation20 + $0x30] sm:$0xff]  }
 0x6be   :  { %v1029_v30 = vsub.f32 %v1026_v28, %v1016_v27  ;;  %1157 = vmatpush1.bf16.msra.mxu1 %v3242_v4  ;;  %2813 = vmatpush3.bf16.msra.mxu0 %v3257_v24  ;;  %v3259_v28 = vld [vmem:[#allocation20 + $0x28] sm:$0xff]  }
 0x6bf   :  { %v3373_v49 = vpop.eup %3372  ;;  %1158 = vmatprep.subr.bf16.mxu1 %v3247_v6 }
 0x6c0   :  { %v1037_v50 = vmul.f32 %v2639_v29, %v1029_v30  ;;  %v1027_v52 = vmul.f32 %v3373_v49, %v1004_v39  ;;  %v3248_v39 = vld [vmem:[#allocation19 + $0x10] ss:$8 sps:$4 sm:$0xff]   ;;  %v3261_v30 = vld [vmem:[#allocation20 + $0x20] sm:$0xff]  }
 0x6c1   :  { %v3263_v49 = vld [vmem:[#allocation20 + $0x18] sm:$0xff]  }
 0x6c2   :  { %v1039_v53 = vadd.f32 %v1037_v50, %v1016_v27  ;;  %v1030_v55 = vsub.f32 %v1027_v52, %v1017_v47  ;;  %1159 = vmatpush1.bf16.msra.mxu1 %v3245_v18  ;;  %v3258_v27 = vld [vmem:[#allocation20 + $0x68] sm:$0xff]   ;;  %v3264_v50 = vld [vmem:[#allocation20 + $0x50] sm:$0xff]  }
 0x6c3   :  { %1160 = vmatprep.subr.bf16.mxu1 %v3250_v37  ;;  %2814 = vmatprep.subr.bf16.mxu0 %v3258_v27  ;;  %v3265_v52 = vld [vmem:[#allocation20 + $0x10] sm:$0xff]  }
 0x6c4   :  { %v1041_v57 = vmul.f32 %v1039_v53, %v1039_v53  ;;  %v1038_v59 = vmul.f32 %v2639_v29, %v1030_v55  ;;  %2815 = vmatpush3.bf16.msra.mxu0 %v3259_v28  ;;  %v3260_v29 = vld [vmem:[#allocation20 + $0x60] sm:$0xff]   ;;  %v3267_v55 = vld [vmem:[#allocation20 + $0x8] sm:$0xff]  }
 0x6c5   :  { %2816 = vmatprep.subr.bf16.mxu0 %v3260_v29 }
 0x6c6   :  { %1043 = vadd.xlane.f32.xlu1 %v1041_v57  ;;  %v1040_v61 = vadd.f32 %v1038_v59, %v1017_v47  ;;  %1161 = vmatpush1.bf16.msra.mxu1 %v3248_v39  ;;  %v3262_v47 = vld [vmem:[#allocation20 + $0x58] sm:$0xff]   ;;  %v3268_v57 = vld [vmem:[#allocation20 + $0x40] sm:$0xff]  }
 0x6c7   :  { %1162 = vmatprep.subr.bf16.mxu1 %v3253_v40  ;;  %v3269_v59 = vld [vmem:[#allocation20] sm:$0xff]  }
 0x6c8   :  { %v1042_v1 = vmul.f32 %v1040_v61, %v1040_v61  ;;  %2817 = vmatpush3.bf16.msra.mxu0 %v3261_v30 }
 0x6c9   :  { %2818 = vmatprep.subr.bf16.mxu0 %v3262_v47 }
 0x6ca   :  { %1045 = vadd.xlane.f32.xlu0 %v1042_v1  ;;  %1163 = vmatpush1.bf16.msra.mxu1 %v3251_v41 }
 0x6cc   :  { %2819 = vmatpush3.bf16.msra.mxu0 %v3263_v49 }
 0x6cd   :  { %2820 = vmatprep.subr.bf16.mxu0 %v3264_v50 }
 0x6d0   :  { %2821 = vmatpush3.bf16.msra.mxu0 %v3265_v52 }
 0x74f   :  { %v1044_v42 = vpop.xlane.xlu1 %1043 }
 0x750   :  { %3374 = vrsqrt.f32 %v1044_v42 }
 0x753   :  { %v1046_v43 = vpop.xlane.xlu0 %1045 }
 0x754   :  { %3376 = vrsqrt.f32 %v1046_v43 }
 0x75d   :  { %v3375_v44 = vpop.eup %3374 }
 0x75e   :  { %v4120_v45 = vmul.f32 %v3375_v44, %v1039_v53  ;;  %v3266_v53 = vld [vmem:[#allocation20 + $0x48] sm:$0xff]  }
 0x75f   :  { %2822 = vmatprep.subr.bf16.mxu0 %v3266_v53 }
 0x760   :  { %v1406_v46 = vmul.f32 %v4120_v45, %v4120_v45  ;;  %2823 = vmatpush3.bf16.msra.mxu0 %v3267_v55 }
 0x761   :  { %v3377_v22 = vpop.eup %3376  ;;  %2824 = vmatprep.subr.bf16.mxu0 %v3268_v57 }
 0x762   :  { %1408 = vadd.xlane.f32.xlu1 %v1406_v46  ;;  %v4124_v26 = vmul.f32 %v3377_v22, %v1040_v61  ;;  %v1193_v61 = vlaneseq }
 0x764   :  { %v1407_v20 = vmul.f32 %v4124_v26, %v4124_v26  ;;  %v1051_v25 = vpack.c.bf16 %v4124_v26, %v4120_v45  ;;  %2825 = vmatpush3.bf16.msra.mxu0 %v3269_v59  ;;  %v4132_v1 = vshrl.u32 %v1193_v61, 7 }
 0x765   :  { %3033 = vmatprep.subr.bf16.mxu0 %v3766_v21 }
 0x766   :  { %1410 = vadd.xlane.f32.xlu0 %v1407_v20  ;;  %1181 = vmatmul.mubr.bf16.vlgmr.msra.gmra.mxu1 %v1051_v25  ;;  %v1195_v17 = vsub.s32 0, %v4132_v1  ;;  %v1199_v4 = vsub.s32 1, %v4132_v1 }
 0x767   :  { %1643 = vmatprep.mubr.bf16.mxu1 %v3765_v0 }
 0x768   :  { %v1196_v5 = vrot.slane %v1191_v3, %v1195_v17  ;;  %v1200_v6 = vrot.slane %v1191_v3, %v1199_v4 }
 0x826   :  { %v1182_v18 = vpop.f32.mrf.mxu1 }
 0x827   :  { %v1203_v37 = vmul.f32 %v1196_v5, %v1182_v18 }
 0x828   :  { %v1184_v39 = vpop.f32.mrf.mxu1 }
 0x829   :  { %v2656_v40 = vmul.f32 -1.442695, %v1203_v37  ;;  %v1204_v41 = vmul.f32 %v1200_v6, %v1184_v39 }
 0x82a   :  { %v1186_v42 = vpop.f32.mrf.mxu1 }
 0x82b   :  { %v2657_v43 = vmul.f32 -1.442695, %v1204_v41  ;;  %v1205_v44 = vmul.f32 %v1196_v5, %v1186_v42  ;;  %3378 = vpow2.f32 %v2656_v40 }
 0x82c   :  { %v1188_v46 = vpop.f32.mrf.mxu1 }
 0x82d   :  { %3380 = vpow2.f32 %v2657_v43  ;;  %v2658_v22 = vmul.f32 -1.442695, %v1205_v44  ;;  %v1206_v20 = vmul.f32 %v1200_v6, %v1188_v46 }
 0x82f   :  { %3382 = vpow2.f32 %v2658_v22  ;;  %v2659_v25 = vmul.f32 -1.442695, %v1206_v20  ;;  %v3276_v22 = vld [vmem:[#allocation16 + $0x154] ss:$12 sps:$4 sm:$0xff]  }
 0x831   :  { %3384 = vpow2.f32 %v2659_v25  ;;  %v3274_v25 = vld [vmem:[#allocation16 + $0x150] ss:$12 sps:$4 sm:$0xff]  }
 0x838   :  { %v3379_v19 = vpop.eup %3378 }
 0x839   :  { %v1219_v27 = vadd.f32 1.0, %v3379_v19  ;;  %v3280_v19 = vld [vmem:[#allocation16 + $0x13c] ss:$12 sps:$4 sm:$0xff]  }
 0x83a   :  { %v3381_v16 = vpop.eup %3380 }
 0x83b   :  { %v1220_v23 = vadd.f32 1.0, %v3381_v16  ;;  %v3281_v16 = vld [vmem:[#allocation16 + $0x140] ss:$12 sps:$4 sm:$0xff]  }
 0x83c   :  { %v3383_v24 = vpop.eup %3382 }
 0x83d   :  { %v1221_v28 = vadd.f32 1.0, %v3383_v24  ;;  %3386 = vrcp.f32 %v1220_v23  ;;  %v3278_v23 = vld [vmem:[#allocation16 + $0x138] ss:$12 sps:$4 sm:$0xff]   ;;  %v1409_v24 = vpop.xlane.xlu1 %1408 }
 0x83e   :  { %v3385_v29 = vpop.eup %3384 }
 0x83f   :  { %3388 = vrcp.f32 %v1221_v28  ;;  %v1222_v30 = vadd.f32 1.0, %v3385_v29 }
 0x840   :  { %3390 = vrcp.f32 %v1219_v27  ;;  %v1411_v27 = vpop.xlane.xlu0 %1410 }
 0x841   :  { %3392 = vrcp.f32 %v1222_v30 }
 0x842   :  { %3394 = vrsqrt.f32 %v1409_v24  ;;  %v3301_v24 = vld [vmem:[#allocation16 + $0xc8] ss:$12 sps:$4 sm:$0xff]  }
 0x84a   :  { %v3387_v47 = vpop.eup %3386 }
 0x84b   :  { %v1232_v55 = vmul.f32 %v3387_v47, %v1204_v41  ;;  %v3270_v41 = vld [vmem:[#allocation16 + $0x168] ss:$12 sps:$4 sm:$0xff]  }
 0x84c   :  { %v3389_v49 = vpop.eup %3388 }
 0x84d   :  { %v3391_v50 = vpop.eup %3390  ;;  %v1233_v53 = vmul.f32 %v3389_v49, %v1205_v44  ;;  %v3272_v44 = vld [vmem:[#allocation16 + $0x16c] ss:$12 sps:$4 sm:$0xff]  }
 0x84e   :  { %v3393_v52 = vpop.eup %3392  ;;  %v1231_v59 = vmul.f32 %v3391_v50, %v1203_v37  ;;  %v3273_v37 = vld [vmem:[#allocation16 + $0x170] ss:$12 sps:$4 sm:$0xff]   ;;  %1611 = vmatprep.subr.bf16.mxu1 %v3272_v44  ;;  %v3286_v44 = vld [vmem:[#allocation16 + $0x108] ss:$12 sps:$4 sm:$0xff]  }
 0x84f   :  { %v1234_v57 = vmul.f32 %v3393_v52, %v1206_v20  ;;  %v3277_v20 = vld [vmem:[#allocation16 + $0x158] ss:$12 sps:$4 sm:$0xff]   ;;  %1612 = vmatpush1.bf16.msra.mxu1 %v3270_v41  ;;  %v3395_v30 = vpop.eup %3394  ;;  %v3285_v41 = vld [vmem:[#allocation16 + $0x128] ss:$12 sps:$4 sm:$0xff]  }
 0x850   :  { %v1235_v3 = vpack.c.bf16 %v1233_v53, %v1231_v59  ;;  %1613 = vmatprep.subr.bf16.mxu1 %v3276_v22  ;;  %v1414_v49 = vmul.f32 %v3395_v30, %v4120_v45  ;;  %v2676_v53 = vld [vmem:[%s4331_s15] ss:$0 sm:$0xff]  ;;  %v3293_v22 = vld [vmem:[#allocation16 + $0xf8] ss:$12 sps:$4 sm:$0xff]  }
 0x851   :  { %v1236_v61 = vpack.c.bf16 %v1234_v57, %v1232_v55  ;;  %v3282_v45 = vld [vmem:[#allocation16 + $0x120] ss:$12 sps:$4 sm:$0xff]  }
 0x853   :  { %1397 = vmatprep.mubr.bf16.mxu0 %v1236_v61  ;;  %1614 = vmatpush1.bf16.msra.mxu1 %v3274_v25  ;;  %v3296_v25 = vld [vmem:[#allocation16 + $0xdc] ss:$12 sps:$4 sm:$0xff]  }
 0x854   :  { %1398 = vmatmul.mubr.bf16.vlgmr.msra.gmra.mxu0 %v1235_v3  ;;  %1615 = vmatprep.subr.bf16.mxu1 %v3280_v19  ;;  %v3297_v19 = vld [vmem:[#allocation16 + $0xe0] ss:$12 sps:$4 sm:$0xff]  }
 0x855   :  { %3049 = vmatprep.mubr.msk.bf16.mxu0 %vm3767_vm0, %v3766_v21  ;;  %3034 = vmatpush3.bf16.msra.mxu0 %v3273_v37  ;;  %v3288_v37 = vld [vmem:[#allocation16 + $0x10c] ss:$12 sps:$4 sm:$0xff]  }
 0x856   :  { %3035 = vmatprep.subr.bf16.mxu0 %v3766_v21 }
 0x857   :  { %1616 = vmatpush1.bf16.msra.mxu1 %v3278_v23  ;;  %v3300_v23 = vld [vmem:[#allocation16 + $0xc4] ss:$12 sps:$4 sm:$0xff]  }
 0x859   :  { %3036 = vmatpush3.bf16.msra.mxu0 %v3277_v20  ;;  %v3290_v20 = vld [vmem:[#allocation16 + $0xf0] ss:$12 sps:$4 sm:$0xff]  }
 0x85a   :  { %3037 = vmatprep.subr.bf16.mxu0 %v3766_v21 }
 0x85d   :  { %3038 = vmatpush3.bf16.msra.mxu0 %v3281_v16  ;;  %v3294_v16 = vld [vmem:[#allocation16 + $0xd8] ss:$12 sps:$4 sm:$0xff]  }
 0x85e   :  { %3039 = vmatprep.subr.bf16.mxu0 %v3766_v21 }
 0x861   :  { %3040 = vmatpush3.bf16.msra.mxu0 %v3285_v41 }
 0x862   :  { %3041 = vmatprep.subr.bf16.mxu0 %v3766_v21 }
 0x914   :  { %v2826_v5 = vpop.f32.mrf.mxu0 }
 0x916   :  { %v2827_v6 = vpop.f32.mrf.mxu0 }
 0x917   :  { %v2828_v18 = vadd.f32 %v2827_v6, %v2826_v5 }
 0x918   :  { %v2829_v39 = vpop.f32.mrf.mxu0 }
 0x919   :  { %v1416_v40 = vmul.f32 %v2828_v18, %v2828_v18 }
 0x91a   :  { %v2830_v42 = vpop.f32.mrf.mxu0 }
 0x91b   :  { %v2831_v43 = vadd.f32 %v2830_v42, %v2829_v39  ;;  %1418 = vadd.xlane.f32.xlu1 %v1416_v40 }
 0x91d   :  { %v1417_v46 = vmul.f32 %v2831_v43, %v2831_v43 }
 0x91f   :  { %1420 = vadd.xlane.f32.xlu0 %v1417_v46 }
 0x9a4   :  { %v1419_v28 = vpop.xlane.xlu1 %1418 }
 0x9a5   :  { %3396 = vrsqrt.f32 %v1419_v28 }
 0x9a6   :  { %3398 = vrsqrt.f32 %v1411_v27  ;;  %v3298_v27 = vld [vmem:[#allocation16 + $0xc0] ss:$12 sps:$4 sm:$0xff]  }
 0x9a8   :  { %v1421_v29 = vpop.xlane.xlu0 %1420 }
 0x9a9   :  { %3400 = vrsqrt.f32 %v1421_v29 }
 0x9b2   :  { %v3397_v47 = vpop.eup %3396 }
 0x9b3   :  { %v1424_v50 = vmul.f32 %v3397_v47, %v2828_v18  ;;  %v3399_v52 = vpop.eup %3398  ;;  %v3284_v18 = vld [vmem:[#allocation16 + $0x124] ss:$12 sps:$4 sm:$0xff]  }
 0x9b4   :  { %v1415_v61 = vmul.f32 %v3399_v52, %v4124_v26  ;;  %1617 = vmatprep.subr.bf16.mxu1 %v3284_v18  ;;  %v3289_v26 = vld [vmem:[#allocation16 + $0x110] ss:$12 sps:$4 sm:$0xff]  }
 0x9b5   :  { %v1427_v55 = vsub.f32 %v1424_v50, %v1414_v49  ;;  %1618 = vmatpush1.bf16.msra.mxu1 %v3282_v45  ;;  %3042 = vmatpush3.bf16.msra.mxu0 %v3289_v26  ;;  %v3467_v26 = vld [vmem:[#allocation7] sm:$0xff] }
 0x9b6   :  { %v3401_v57 = vpop.eup %3400  ;;  %1619 = vmatprep.subr.bf16.mxu1 %v3288_v37  ;;  %3043 = vmatprep.subr.bf16.mxu0 %v3766_v21 }
 0x9b7   :  { %v1435_v59 = vmul.f32 %v2676_v53, %v1427_v55  ;;  %v1425_v3 = vmul.f32 %v3401_v57, %v2831_v43  ;;  %v3292_v43 = vld [vmem:[#allocation16 + $0xf4] ss:$12 sps:$4 sm:$0xff]   ;;  %v3464_v57 = vld [vmem:[#allocation8 + $0x28] sm:$0xff]  }
 0x9b8   :  { %v3463_v55 = vld [vmem:[#allocation8 + $0x30] sm:$0xff]  }
 0x9b9   :  { %v1437_v5 = vadd.f32 %v1435_v59, %v1414_v49  ;;  %v1428_v6 = vsub.f32 %v1425_v3, %v1415_v61  ;;  %1620 = vmatpush1.bf16.msra.mxu1 %v3286_v44  ;;  %3044 = vmatpush3.bf16.msra.mxu0 %v3293_v22  ;;  %v3465_v59 = vld [vmem:[#allocation8 + $0x20] sm:$0xff]  }
 0x9ba   :  { %1621 = vmatprep.subr.bf16.mxu1 %v3292_v43  ;;  %3045 = vmatprep.subr.bf16.mxu0 %v3766_v21  ;;  %v3468_v22 = vld [vmem:[#allocation5] sm:$0xff] }
 0x9bb   :  { %v1439_v39 = vmul.f32 %v1437_v5, %v1437_v5  ;;  %v1436_v40 = vmul.f32 %v2676_v53, %v1428_v6  ;;  %v3462_v53 = vld [vmem:[#allocation8 + $0x38] sm:$0xff]  }
 0x9bd   :  { %1441 = vadd.xlane.f32.xlu1 %v1439_v39  ;;  %v1438_v42 = vadd.f32 %v1436_v40, %v1415_v61  ;;  %1622 = vmatpush1.bf16.msra.mxu1 %v3290_v20  ;;  %v3466_v61 = vld [vmem:[#allocation8 + $0x18] sm:$0xff]  }
 0x9be   :  { %1623 = vmatprep.subr.bf16.mxu1 %v3296_v25  ;;  %3046 = vmatpush3.bf16.msra.mxu0 %v3297_v19 }
 0x9bf   :  { %v1440_v46 = vmul.f32 %v1438_v42, %v1438_v42  ;;  %3047 = vmatprep.subr.bf16.mxu0 %v3766_v21 }
 0x9c1   :  { %1443 = vadd.xlane.f32.xlu0 %v1440_v46  ;;  %1624 = vmatpush1.bf16.msra.mxu1 %v3294_v16  ;;  %v3469_v16 = vld [vmem:[#allocation5 + $0x8] sm:$0xff] }
 0x9c2   :  { %1625 = vmatprep.subr.bf16.mxu1 %v3300_v23  ;;  %3048 = vmatpush3.bf16.msra.mxu0 %v3301_v24 }
 0x9c3   :  { %3073 = vmatprep.subr.bf16.mxu0 %v3766_v21 }
 0x9c5   :  { %1626 = vmatpush1.bf16.msra.mxu1 %v3298_v27 }
 0x9c6   :  { %3053 = vmatprep.subr.bf16.mxu1 %v3766_v21 }
 0xa46   :  { %v1442_v28 = vpop.xlane.xlu1 %1441 }
 0xa47   :  { %3402 = vrsqrt.f32 %v1442_v28  ;;  %v3470_v28 = vld [vmem:[#allocation7 + $0x8] sm:$0xff] }
 0xa4a   :  { %v1444_v29 = vpop.xlane.xlu0 %1443 }
 0xa4b   :  { %3404 = vrsqrt.f32 %v1444_v29 }
 0xa54   :  { %v3403_v30 = vpop.eup %3402 }
 0xa55   :  { %v4159_v49 = vmul.f32 %v3403_v30, %v1437_v5 }
 0xa58   :  { %v3405_v47 = vpop.eup %3404 }
 0xa59   :  { %v4161_v50 = vmul.f32 %v3405_v47, %v1438_v42 }
 0xa5b   :  { %v1449_v52 = vpack.c.bf16 %v4161_v50, %v4159_v49 }
 0xa5d   :  { %1644 = vmatmul.mubr.bf16.vlgmr.msra.gmra.mxu1 %v1449_v52  ;;  %3050 = vmatmul.mubr.bf16.vlgmr.msra.gmra.mxu0 %v1449_v52 }
 0xa5e   :  { %3074 = vmatpush3.bf16.msra.mxu0 %v3462_v53  ;;  %3054 = vmatpush3.bf16.msra.mxu1 %v3462_v53 }
 0xa5f   :  { %3075 = vmatprep.subr.bf16.mxu0 %v3766_v21  ;;  %3055 = vmatprep.subr.bf16.mxu1 %v3766_v21 }
 0xa60   :  { %3089 = vmatprep.mubr.msk.bf16.mxu0 %vm3767_vm0, %v3766_v21  ;;  %3069 = vmatprep.mubr.msk.bf16.mxu1 %vm3767_vm0, %v3766_v21 }
 0xa62   :  { %3076 = vmatpush3.bf16.msra.mxu0 %v3463_v55  ;;  %3056 = vmatpush3.bf16.msra.mxu1 %v3463_v55 }
 0xa63   :  { %3077 = vmatprep.subr.bf16.mxu0 %v3766_v21  ;;  %3057 = vmatprep.subr.bf16.mxu1 %v3766_v21 }
 0xa66   :  { %3078 = vmatpush3.bf16.msra.mxu0 %v3464_v57  ;;  %3058 = vmatpush3.bf16.msra.mxu1 %v3464_v57 }
 0xa67   :  { %3079 = vmatprep.subr.bf16.mxu0 %v3766_v21  ;;  %3059 = vmatprep.subr.bf16.mxu1 %v3766_v21 }
 0xa6a   :  { %3080 = vmatpush3.bf16.msra.mxu0 %v3465_v59  ;;  %3060 = vmatpush3.bf16.msra.mxu1 %v3465_v59 }
 0xa6b   :  { %3081 = vmatprep.subr.bf16.mxu0 %v3766_v21  ;;  %3061 = vmatprep.subr.bf16.mxu1 %v3766_v21 }
 0xa6e   :  { %3082 = vmatpush3.bf16.msra.mxu0 %v3466_v61  ;;  %3062 = vmatpush3.bf16.msra.mxu1 %v3466_v61 }
 0xa6f   :  { %3083 = vmatprep.subr.bf16.mxu0 %v3766_v21  ;;  %3063 = vmatprep.subr.bf16.mxu1 %v3766_v21 }
 0xa72   :  { %3084 = vmatpush3.bf16.msra.mxu0 %v3956_v34  ;;  %3064 = vmatpush3.bf16.msra.mxu1 %v3956_v34 }
 0xa73   :  { %3085 = vmatprep.subr.bf16.mxu0 %v3766_v21  ;;  %3065 = vmatprep.subr.bf16.mxu1 %v3766_v21 }
 0xa76   :  { %3086 = vmatpush3.bf16.msra.mxu0 %v3962_v35  ;;  %3066 = vmatpush3.bf16.msra.mxu1 %v3962_v35 }
 0xa77   :  { %3087 = vmatprep.subr.bf16.mxu0 %v3766_v21  ;;  %3067 = vmatprep.subr.bf16.mxu1 %v3766_v21 }
 0xa7a   :  { %3088 = vmatpush3.bf16.msra.mxu0 %v3968_v36  ;;  %3068 = vmatpush3.bf16.msra.mxu1 %v3968_v36 }
 0xa7b   :  { %3136 = vmatprep.subr.bf16.mxu0 %v3766_v21 }
 0xb1d   :  { %v1645_v3 = vpop.f32.mrf.mxu1  ;;  %v1688_v34 = vpop.f32.mrf.mxu0 }
 0xb1e   :  { %v4192_v39 = vmul.f32 %v1688_v34, %v3985_v9  ;;  %v4195_v42 = vmul.f32 %v1688_v34, %v3987_v10  ;;  %v4207_v18 = vmul.f32 %v1688_v34, %v3983_v8  ;;  %v4210_v9 = vmul.f32 %v1688_v34, %v3989_v11 }
 0xb1f   :  { %v1647_v5 = vpop.f32.mrf.mxu1  ;;  %v3051_v6 = vpop.f32.mrf.mxu0  ;;  %v1695_v30 = vmul.f32 %v3468_v22, %v1645_v3 }
 0xb20   :  { %1707 = vrot.lane.b32.xlu1 %v1647_v5, %s3751_s0  ;;  %v1705_v20 = vmul.f32 %v3468_v22, %v1647_v5 }
 0xb21   :  { %v1649_v35 = vpop.f32.mrf.mxu1  ;;  %v1691_v40 = vpop.f32.mrf.mxu0 }
 0xb22   :  { %v4198_v46 = vmul.f32 %v1691_v40, %v3991_v12  ;;  %v4201_v36 = vmul.f32 %v1691_v40, %v3993_v13  ;;  %v4204_v45 = vmul.f32 %v1691_v40, %v3995_v14  ;;  %v4213_v41 = vmul.f32 %v1691_v40, %v3997_v15 }
 0xb23   :  { %v1651_v10 = vpop.f32.mrf.mxu1  ;;  %v3052_v44 = vpop.f32.mrf.mxu0  ;;  %v2121_v14 = vmul.f32 %v4159_v49, %v4159_v49  ;;  %v2122_v15 = vmul.f32 %v4161_v50, %v4161_v50  ;;  %v1696_v52 = vmul.f32 %v3469_v16, %v1649_v35 }
 0xb24   :  { %1697 = vrot.lane.b32.xlu1 %v1645_v3, %s3751_s0  ;;  %1709 = vrot.lane.b32.xlu0 %v1651_v10, %s3751_s0  ;;  %v1968_v12 = vpack.c.bf16 %v4204_v45, %v4195_v42  ;;  %v1967_v13 = vpack.c.bf16 %v4201_v36, %v4192_v39  ;;  %v1969_v8 = vpack.c.bf16 %v4213_v41, %v4210_v9  ;;  %v3306_v39 = vld [vmem:[#allocation17 + $0x58] sm:$0xff]   ;;  %v3307_v42 = vld [vmem:[#allocation17 + $0x50] sm:$0xff]  }
 0xb25   :  { %v1966_v11 = vpack.c.bf16 %v4198_v46, %v4207_v18  ;;  %v1706_v23 = vmul.f32 %v3469_v16, %v1651_v10 }
 0xb28   :  { %1699 = vrot.lane.b32.xlu1 %v1649_v35, %s3751_s0 }
 0xb43   :  { %2123 = vadd.xlane.f32.xlu0 %v2121_v14 }
 0xb4c   :  { %2125 = vadd.xlane.f32.xlu1 %v2122_v15 }
 0xb92   :  { %v1708_v37 = vpop.permute.xlu1 %1707 }
 0xb93   :  { %v1711_v43 = vmul.f32 %v3467_v26, %v1708_v37 }
 0xb95   :  { %v1713_v24 = vadd.f32 %v1711_v43, %v1705_v20 }
 0xb96   :  { %v1698_v25 = vpop.permute.xlu1 %1697  ;;  %v1710_v19 = vpop.permute.xlu0 %1709 }
 0xb97   :  { %v1701_v27 = vmul.f32 %v3467_v26, %v1698_v25  ;;  %v1712_v29 = vmul.f32 %v3470_v28, %v1710_v19  ;;  %v1773_v55 = vmul.f32 %v1713_v24, %v1713_v24  ;;  %v2702_v25 = vld [vmem:[%s4328_s12 + $0x1] ss:$0 sm:$0xff] }
 0xb99   :  { %v1714_v47 = vadd.f32 %v1712_v29, %v1706_v23  ;;  %v1703_v57 = vadd.f32 %v1701_v27, %v1695_v30 }
 0xb9a   :  { %v1700_v53 = vpop.permute.xlu1 %1699 }
 0xb9b   :  { %v1774_v59 = vmul.f32 %v1714_v47, %v1714_v47  ;;  %v1702_v61 = vmul.f32 %v3470_v28, %v1700_v53  ;;  %v1715_v40 = vmul.f32 %v1703_v57, %v1703_v57 }
 0xb9d   :  { %v1775_v34 = vpack.c.bf16 %v1774_v59, %v1773_v55  ;;  %v1704_v6 = vadd.f32 %v1702_v61, %v1696_v52 }
 0xb9f   :  { %v1716_v5 = vmul.f32 %v1704_v6, %v1704_v6  ;;  %3090 = vmatmul.mubr.bf16.vlgmr.msra.gmra.mxu0 %v1775_v34  ;;  %v3309_v34 = vld [vmem:[#allocation17 + $0x40] sm:$0xff]  }
 0xba0   :  { %3152 = vmatprep.mubr.msk.bf16.mxu0 %vm3767_vm0, %v3766_v21 }
 0xba1   :  { %v1717_v10 = vpack.c.bf16 %v1716_v5, %v1715_v40 }
 0xba3   :  { %3070 = vmatmul.mubr.bf16.vlgmr.msra.gmra.mxu1 %v1717_v10 }
 0xc5f   :  { %v1810_v44 = vpop.f32.mrf.mxu0 }
 0xc60   :  { %3406 = vrsqrt.f32 %v1810_v44 }
 0xc61   :  { %v3091_v14 = vpop.f32.mrf.mxu0 }
 0xc63   :  { %v1752_v3 = vpop.f32.mrf.mxu1  ;;  %v1813_v35 = vpop.f32.mrf.mxu0 }
 0xc64   :  { %3408 = vrsqrt.f32 %v1752_v3 }
 0xc65   :  { %3410 = vrsqrt.f32 %v1813_v35  ;;  %v3071_v15 = vpop.f32.mrf.mxu1  ;;  %v3092_v37 = vpop.f32.mrf.mxu0 }
 0xc67   :  { %v1755_v26 = vpop.f32.mrf.mxu1 }
 0xc68   :  { %3412 = vrsqrt.f32 %v1755_v26 }
 0xc69   :  { %v3072_v43 = vpop.f32.mrf.mxu1 }
 0xc6a   :  { %v3312_v43 = vld [vmem:[#allocation19 + $0xf4] ss:$8 sps:$4 sm:$0xff]  }
 0xc6d   :  { %v3407_v22 = vpop.eup %3406 }
 0xc6e   :  { %v1819_v27 = vmul.f32 %v3407_v22, %v1713_v24  ;;  %v3315_v22 = vld [vmem:[#allocation19 + $0xe4] ss:$8 sps:$4 sm:$0xff]  }
 0xc70   :  { %v1827_v30 = vmul.f32 %v1819_v27, %v4036_v51  ;;  %v1825_v53 = vmul.f32 %v1819_v27, %v4043_v56 }
 0xc71   :  { %v3409_v20 = vpop.eup %3408 }
 0xc72   :  { %v3411_v19 = vpop.eup %3410  ;;  %v1761_v16 = vmul.f32 %v3409_v20, %v1703_v57  ;;  %v3318_v20 = vld [vmem:[#allocation19 + $0xd4] ss:$8 sps:$4 sm:$0xff]  }
 0xc73   :  { %v1820_v23 = vmul.f32 %v3411_v19, %v1714_v47  ;;  %v1821_v47 = vmul.f32 %v1819_v27, %v4055_v2  ;;  %v2124_v19 = vpop.xlane.xlu0 %2123 }
 0xc74   :  { %v1771_v28 = vmul.f32 %v2702_v25, %v1761_v16  ;;  %v2126_v16 = vpop.xlane.xlu1 %2125 }
 0xc75   :  { %v1828_v29 = vmul.f32 %v1820_v23, %v4034_v48  ;;  %v1826_v52 = vmul.f32 %v1820_v23, %v4040_v54  ;;  %v1824_v24 = vmul.f32 %v1820_v23, %v4046_v58  ;;  %v1823_v48 = vmul.f32 %v1819_v27, %v4049_v60  ;;  %v3413_v54 = vpop.eup %3412 }
 0xc76   :  { %3109 = vmatprep.mubr.f32.mxu1 %v1771_v28  ;;  %v1822_v51 = vmul.f32 %v1820_v23, %v4052_v63  ;;  %v1762_v56 = vmul.f32 %v3413_v54, %v1704_v6 }
 0xc77   :  { %3093 = vmatprep.subr.mxu1 %v1828_v29 }
 0xc78   :  { %3094 = vmatpush3.xpose.msra.mxu1 %v1828_v29  ;;  %v1772_v55 = vmul.f32 %v2702_v25, %v1762_v56  ;;  %v3316_v25 = vld [vmem:[#allocation19 + $0xd0] ss:$8 sps:$4 sm:$0xff]  }
 0xc79   :  { %3095 = vmatprep.subr.mxu1 %v1827_v30 }
 0xc7c   :  { %3096 = vmatpush3.xpose.msra.mxu1 %v1827_v30 }
 0xc7d   :  { %3097 = vmatprep.subr.mxu1 %v1826_v52 }
 0xc80   :  { %3098 = vmatpush3.xpose.msra.mxu1 %v1826_v52 }
 0xc81   :  { %3099 = vmatprep.subr.mxu1 %v1825_v53 }
 0xc84   :  { %3100 = vmatpush3.xpose.msra.mxu1 %v1825_v53 }
 0xc85   :  { %3101 = vmatprep.subr.mxu1 %v1824_v24 }
 0xc88   :  { %3102 = vmatpush3.xpose.msra.mxu1 %v1824_v24  ;;  %v2714_v24 = vld [vmem:[%s4330_s14 + $0x1] ss:$0 sm:$0xff] }
 0xc89   :  { %3103 = vmatprep.subr.mxu1 %v1823_v48 }
 0xc8c   :  { %3104 = vmatpush3.xpose.msra.mxu1 %v1823_v48 }
 0xc8d   :  { %3105 = vmatprep.subr.mxu1 %v1822_v51 }
 0xc90   :  { %3106 = vmatpush3.xpose.msra.mxu1 %v1822_v51 }
 0xc91   :  { %3107 = vmatprep.subr.mxu1 %v1821_v47 }
 0xc94   :  { %3108 = vmatpush3.xpose.msra.mxu1 %v1821_v47 }
 0xc95   :  { %3112 = vmatprep.subr.bf16.mxu1 %v3766_v21 }
 0xc97   :  { %3110 = vmatmul.mubr.f32.vlgmr.msra.gmra.mxu1 %v1772_v55 }
 0xc98   :  { %3113 = vmatpush3.bf16.msra.mxu1 %v4062_v7  ;;  %3120 = vmatprep.mubr.msk.bf16.mxu1 %vm3767_vm0, %v3766_v21 }
 0xc99   :  { %3114 = vmatprep.subr.bf16.mxu1 %v3766_v21 }
 0xc9c   :  { %3115 = vmatpush3.bf16.msra.mxu1 %v4065_v31 }
 0xc9d   :  { %3116 = vmatprep.subr.bf16.mxu1 %v3766_v21 }
 0xca0   :  { %3117 = vmatpush3.bf16.msra.mxu1 %v4069_v62  ;;  %v3302_v62 = vld [vmem:[#allocation17 + $0x78] sm:$0xff]  }
 0xca1   :  { %3118 = vmatprep.subr.bf16.mxu1 %v3766_v21  ;;  %3137 = vmatpush3.bf16.msra.mxu0 %v3302_v62  ;;  %v3325_v62 = vld [vmem:[#allocation19 + $0xa0] ss:$8 sps:$4 sm:$0xff]  }
 0xca2   :  { %3138 = vmatprep.subr.bf16.mxu0 %v3766_v21 }
 0xca4   :  { %3119 = vmatpush3.bf16.msra.mxu1 %v4073_v32  ;;  %v3303_v32 = vld [vmem:[#allocation17 + $0x70] sm:$0xff]  }
 0xca5   :  { %3124 = vmatprep.subr.bf16.mxu1 %v3766_v21  ;;  %3139 = vmatpush3.bf16.msra.mxu0 %v3303_v32  ;;  %v3328_v32 = vld [vmem:[#allocation19 + $0x90] ss:$8 sps:$4 sm:$0xff]  }
 0xca6   :  { %3140 = vmatprep.subr.bf16.mxu0 %v3766_v21 }
 0xd57   :  { %v3111_v58 = vpop.f32.mrf.mxu1 }
 0xd58   :  { %v1901_v60 = vadd.f32 %v3111_v58, %v4078_v33  ;;  %v3304_v33 = vld [vmem:[#allocation17 + $0x68] sm:$0xff]  }
 0xd59   :  { %v1895_v63 = vpop.f32.mrf.mxu1  ;;  %3141 = vmatpush3.bf16.msra.mxu0 %v3304_v33  ;;  %v3333_v33 = vld [vmem:[#allocation19 + $0x84] ss:$8 sps:$4 sm:$0xff]  }
 0xd5a   :  { %v1906_v2 = vmul.f32 1.442695, %v1901_v60  ;;  %v1896_v7 = vadd.f32 %v1895_v63, %v4080_v38  ;;  %v3305_v38 = vld [vmem:[#allocation17 + $0x60] sm:$0xff]   ;;  %3142 = vmatprep.subr.bf16.mxu0 %v3766_v21 }
 0xd5c   :  { %v1904_v57 = vmul.f32 1.442695, %v1896_v7  ;;  %3414 = vpow2.f32 %v1906_v2 }
 0xd5d   :  { %3143 = vmatpush3.bf16.msra.mxu0 %v3305_v38  ;;  %v3331_v38 = vld [vmem:[#allocation19 + $0x80] ss:$8 sps:$4 sm:$0xff]  }
 0xd5e   :  { %3416 = vpow2.f32 %v1904_v57  ;;  %3144 = vmatprep.subr.bf16.mxu0 %v3766_v21  ;;  %v3321_v57 = vld [vmem:[#allocation19 + $0xc4] ss:$8 sps:$4 sm:$0xff]  }
 0xd61   :  { %3145 = vmatpush3.bf16.msra.mxu0 %v3306_v39 }
 0xd62   :  { %3146 = vmatprep.subr.bf16.mxu0 %v3766_v21 }
 0xd65   :  { %3147 = vmatpush3.bf16.msra.mxu0 %v3307_v42 }
 0xd66   :  { %3148 = vmatprep.subr.bf16.mxu0 %v3766_v21 }
 0xd69   :  { %v3415_v31 = vpop.eup %3414 }
 0xd6b   :  { %v3417_v59 = vpop.eup %3416 }
 0xd6c   :  { %v1908_v61 = vpack.c.bf16 %v3415_v31, %v3417_v59 }
 0xd6e   :  { %3121 = vmatmul.mubr.msk.bf16.vlgmr.msra.gmra.mxu1 %vm796_vm1, %v1908_v61  ;;  %v3327_v61 = vld [vmem:[#allocation19 + $0xa4] ss:$8 sps:$4 sm:$0xff]  }
 0xd6f   :  { %3125 = vmatpush3.bf16.msra.mxu1 %v1969_v8  ;;  %3132 = vmatprep.mubr.msk.bf16.mxu1 %vm3767_vm0, %v3766_v21 }
 0xd70   :  { %3126 = vmatprep.subr.bf16.mxu1 %v3766_v21 }
 0xd73   :  { %3127 = vmatpush3.bf16.msra.mxu1 %v1968_v12 }
 0xd74   :  { %3128 = vmatprep.subr.bf16.mxu1 %v3766_v21 }
 0xd77   :  { %3129 = vmatpush3.bf16.msra.mxu1 %v1967_v13 }
 0xd78   :  { %3130 = vmatprep.subr.bf16.mxu1 %v3766_v21 }
 0xd7b   :  { %3131 = vmatpush3.bf16.msra.mxu1 %v1966_v11  ;;  %v3308_v11 = vld [vmem:[#allocation17 + $0x48] sm:$0xff]  }
 0xd7c   :  { %3149 = vmatpush3.bf16.msra.mxu0 %v3308_v11  ;;  %2263 = vmatprep.subr.bf16.mxu1 %v3312_v43  ;;  %v3336_v11 = vld [vmem:[#allocation20 + $0xf0] sm:$0xff]   ;;  %v2731_v43 = vld [vmem:[%s4329_s13 + $0x2] sm:$0x3] }
 0xd7d   :  { %3150 = vmatprep.subr.bf16.mxu0 %v3766_v21  ;;  %v3313_v21 = vld [vmem:[#allocation19 + $0xe0] ss:$8 sps:$4 sm:$0xff]  }
 0xd80   :  { %3151 = vmatpush3.bf16.msra.mxu0 %v3309_v34  ;;  %v3337_v34 = vld [vmem:[#allocation20 + $0xb0] sm:$0xff]  }
 0xe2e   :  { %v1946_v46 = vpop.f32.mrf.mxu1 }
 0xe2f   :  { %3418 = vrcp.f32 %v1946_v46 }
 0xe30   :  { %v3122_v36 = vpop.f32.mrf.mxu1 }
 0xe32   :  { %v1949_v45 = vpop.f32.mrf.mxu1 }
 0xe33   :  { %3420 = vrcp.f32 %v1949_v45 }
 0xe34   :  { %v3123_v18 = vpop.f32.mrf.mxu1  ;;  %3422 = vrsqrt.f32 %v2124_v19 }
 0xe3c   :  { %v3419_v9 = vpop.eup %3418 }
 0xe3d   :  { %v1955_v12 = vmul.f32 %v3419_v9, %v3417_v59  ;;  %v3324_v59 = vld [vmem:[#allocation19 + $0xb4] ss:$8 sps:$4 sm:$0xff]  }
 0xe40   :  { %v3421_v41 = vpop.eup %3420 }
 0xe41   :  { %v1956_v13 = vmul.f32 %v3421_v41, %v3415_v31  ;;  %v3423_v28 = vpop.eup %3422  ;;  %v3322_v31 = vld [vmem:[#allocation19 + $0xb0] ss:$8 sps:$4 sm:$0xff]  }
 0xe42   :  { %v2129_v30 = vmul.f32 %v3423_v28, %v4159_v49  ;;  %v3319_v49 = vld [vmem:[#allocation19 + $0xc0] ss:$8 sps:$4 sm:$0xff]  }
 0xe43   :  { %v1965_v8 = vpack.c.bf16 %v1956_v13, %v1955_v12  ;;  %v3334_v13 = vld [vmem:[#allocation20 + $0xf8] sm:$0xff]  }
 0xe44   :  { %2888 = vmatprep.subr.bf16.mxu0 %v3334_v13 }
 0xe45   :  { %3133 = vmatmul.mubr.msk.bf16.vlgmr.msra.gmra.mxu1 %vm796_vm1, %v1965_v8  ;;  %v3335_v8 = vld [vmem:[#allocation20 + $0xb8] sm:$0xff]  }
 0xe46   :  { %2295 = vmatprep.mubr.bf16.mxu1 %v3765_v0  ;;  %v3310_v0 = vld [vmem:[#allocation19 + $0xf0] ss:$8 sps:$4 sm:$0xff]  }
 0xe47   :  { %2264 = vmatpush1.bf16.msra.mxu1 %v3310_v0  ;;  %v3349_v0 = vld [vmem:[#allocation20 + $0x80] sm:$0xff]  }
 0xe48   :  { %2265 = vmatprep.subr.bf16.mxu1 %v3315_v22  ;;  %v2312_v22 = vrot.slane %v2731_v43, %v1195_v17 }
 0xe4b   :  { %2266 = vmatpush1.bf16.msra.mxu1 %v3313_v21  ;;  %v2316_v21 = vrot.slane %v2731_v43, %v1199_v4 }
 0xe4c   :  { %2267 = vmatprep.subr.bf16.mxu1 %v3318_v20 }
 0xe4f   :  { %2268 = vmatpush1.bf16.msra.mxu1 %v3316_v25 }
 0xe50   :  { %2269 = vmatprep.subr.bf16.mxu1 %v3321_v57 }
 0xe53   :  { %2270 = vmatpush1.bf16.msra.mxu1 %v3319_v49 }
 0xe54   :  { %2271 = vmatprep.subr.bf16.mxu1 %v3324_v59 }
 0xe57   :  { %2272 = vmatpush1.bf16.msra.mxu1 %v3322_v31 }
 0xe58   :  { %2273 = vmatprep.subr.bf16.mxu1 %v3327_v61 }
 0xe5b   :  { %2274 = vmatpush1.bf16.msra.mxu1 %v3325_v62 }
 0xf05   :  { %v2007_v6 = vpop.f32.mrf.mxu1 }
 0xf07   :  { %v3134_v40 = vpop.f32.mrf.mxu1 }
 0xf08   :  { %v3339_v40 = vld [vmem:[#allocation20 + $0xa8] sm:$0xff]  }
 0xf09   :  { %v2010_v5 = vpop.f32.mrf.mxu1 }
 0xf0a   :  { %v2014_v10 = vpack.c.bf16 %v2010_v5, %v2007_v6  ;;  %v3338_v6 = vld [vmem:[#allocation20 + $0xe8] sm:$0xff]   ;;  %v3340_v5 = vld [vmem:[#allocation20 + $0xe0] sm:$0xff]  }
 0xf0b   :  { %v3135_v44 = vpop.f32.mrf.mxu1 }
 0xf0c   :  { %3153 = vmatmul.mubr.bf16.vlgmr.msra.gmra.mxu0 %v2014_v10  ;;  %v3341_v10 = vld [vmem:[#allocation20 + $0xa0] sm:$0xff]   ;;  %v3342_v44 = vld [vmem:[#allocation20 + $0xd8] sm:$0xff]  }
 0xf0d   :  { %2889 = vmatpush3.bf16.msra.mxu0 %v3335_v8 }
 0xf0e   :  { %2890 = vmatprep.subr.bf16.mxu0 %v3336_v11 }
 0xf11   :  { %2891 = vmatpush3.bf16.msra.mxu0 %v3337_v34 }
 0xf12   :  { %2892 = vmatprep.subr.bf16.mxu0 %v3338_v6  ;;  %v2753_v6 = vld [vmem:[%s4331_s15 + $0x1] ss:$0 sm:$0xff]  ;;  %s3768_s15 = smov [#allocation22]  }
 0xf13   :  { %s2574_s29 = sshll.u32 %s3768_s15, 4  ;;  %s2575_s29 = int_to_ptr.vmem [resolvable:$true] %s2574_s29 }
 0xf14   :  { %s3711_s9 = scalar_lea.vmem %s2575_s29, 256  ;;  %p3716_p5 = scmp.lt.s32.totalorder %s2575_s29, %s2575_s29 }
 0xf15   :  { %2893 = vmatpush3.bf16.msra.mxu0 %v3339_v40  ;;  %p3712_p4 = scmp.ne.s32.totalorder %s2575_s29, %s3711_s9  ;;  %p3717_p6 = scmp.lt.s32.totalorder %s3711_s9, %s3711_s9 }
 0xf16   :  { %2894 = vmatprep.subr.bf16.mxu0 %v3340_v5 }
 0xf17   :  { %p3718_p7 = por %p3717_p6, %p3716_p5 }
 0xf19   :  { %2895 = vmatpush3.bf16.msra.mxu0 %v3341_v10  ;;  %p3719_p8 = pnand %p3718_p7, %p3712_p4 }
 0xf1a   :  { %2896 = vmatprep.subr.bf16.mxu0 %v3342_v44 }
 0xfcc   :  { %v2114_v14 = vpop.f32.mrf.mxu0 }
 0xfcd   :  { %v2131_v3 = vmul.f32 %v2114_v14, %v2114_v14 }
 0xfce   :  { %v3154_v35 = vpop.f32.mrf.mxu0 }
 0xfcf   :  { %2133 = vadd.xlane.f32.xlu0 %v2131_v3  ;;  %v3344_v3 = vld [vmem:[#allocation20 + $0xd0] sm:$0xff]  }
 0xfd0   :  { %v2117_v15 = vpop.f32.mrf.mxu0  ;;  %v3345_v35 = vld [vmem:[#allocation20 + $0x90] sm:$0xff]  }
 0xfd1   :  { %v2132_v37 = vmul.f32 %v2117_v15, %v2117_v15 }
 0xfd2   :  { %v3155_v26 = vpop.f32.mrf.mxu0 }
 0xfd3   :  { %2135 = vadd.xlane.f32.xlu0 %v2132_v37  ;;  %v3347_v37 = vld [vmem:[#allocation20 + $0x88] sm:$0xff]   ;;  %v3348_v26 = vld [vmem:[#allocation20 + $0xc0] sm:$0xff]  }
0x1058   :  { %v2134_v23 = vpop.xlane.xlu0 %2133 }
0x1059   :  { %3424 = vrsqrt.f32 %v2134_v23 }
0x105a   :  { %3426 = vrsqrt.f32 %v2126_v16 }
0x105c   :  { %v2136_v27 = vpop.xlane.xlu0 %2135 }
0x105d   :  { %3428 = vrsqrt.f32 %v2136_v27 }
0x1066   :  { %v3425_v29 = vpop.eup %3424 }
0x1067   :  { %v2139_v52 = vmul.f32 %v3425_v29, %v2114_v14  ;;  %v3427_v53 = vpop.eup %3426  ;;  %v3343_v14 = vld [vmem:[#allocation20 + $0x98] sm:$0xff]  }
0x1068   :  { %v2130_v47 = vmul.f32 %v3427_v53, %v4161_v50  ;;  %v3330_v50 = vld [vmem:[#allocation19 + $0x94] ss:$8 sps:$4 sm:$0xff]   ;;  %2897 = vmatpush3.bf16.msra.mxu0 %v3343_v14 }
0x1069   :  { %v2143_v48 = vsub.f32 %v2139_v52, %v2129_v30  ;;  %2275 = vmatprep.subr.bf16.mxu1 %v3330_v50  ;;  %2898 = vmatprep.subr.bf16.mxu0 %v3344_v3 }
0x106a   :  { %v3429_v51 = vpop.eup %3428  ;;  %2276 = vmatpush1.bf16.msra.mxu1 %v3328_v32 }
0x106b   :  { %v2151_v54 = vmul.f32 %v2714_v24, %v2143_v48  ;;  %v2140_v56 = vmul.f32 %v3429_v51, %v2117_v15  ;;  %2277 = vmatprep.subr.bf16.mxu1 %v3333_v33  ;;  %v3346_v15 = vld [vmem:[#allocation20 + $0xc8] sm:$0xff]  }
0x106c   :  { %2899 = vmatpush3.bf16.msra.mxu0 %v3345_v35 }
0x106d   :  { %v2153_v55 = vadd.f32 %v2151_v54, %v2129_v30  ;;  %v2144_v58 = vsub.f32 %v2140_v56, %v2130_v47  ;;  %2900 = vmatprep.subr.bf16.mxu0 %v3346_v15 }
0x106e   :  { %2278 = vmatpush1.bf16.msra.mxu1 %v3331_v38 }
0x106f   :  { %v2155_v60 = vmul.f32 %v2153_v55, %v2153_v55  ;;  %v2152_v63 = vmul.f32 %v2714_v24, %v2144_v58 }
0x1070   :  { %2901 = vmatpush3.bf16.msra.mxu0 %v3347_v37 }
0x1071   :  { %2157 = vadd.xlane.f32.xlu1 %v2155_v60  ;;  %v2154_v2 = vadd.f32 %v2152_v63, %v2130_v47  ;;  %2902 = vmatprep.subr.bf16.mxu0 %v3348_v26 }
0x1073   :  { %v2156_v7 = vmul.f32 %v2154_v2, %v2154_v2 }
0x1074   :  { %2903 = vmatpush3.bf16.msra.mxu0 %v3349_v0 }
0x1075   :  { %2159 = vadd.xlane.f32.xlu0 %v2156_v7 }
0x10fa   :  { %v2158_v39 = vpop.xlane.xlu1 %2157 }
0x10fb   :  { %3430 = vrsqrt.f32 %v2158_v39 }
0x10fe   :  { %v2160_v42 = vpop.xlane.xlu0 %2159 }
0x10ff   :  { %3432 = vrsqrt.f32 %v2160_v42 }
0x1108   :  { %v3431_v46 = vpop.eup %3430 }
0x1109   :  { %v4288_v36 = vmul.f32 %v3431_v46, %v2153_v55 }
0x110b   :  { %v2523_v45 = vmul.f32 %v4288_v36, %v4288_v36 }
0x110c   :  { %v3433_v18 = vpop.eup %3432 }
0x110d   :  { %2525 = vadd.xlane.f32.xlu1 %v2523_v45  ;;  %v4292_v9 = vmul.f32 %v3433_v18, %v2154_v2 }
0x110f   :  { %v2524_v41 = vmul.f32 %v4292_v9, %v4292_v9  ;;  %v2165_v12 = vpack.c.bf16 %v4292_v9, %v4288_v36 }
0x1111   :  { %2527 = vadd.xlane.f32.xlu0 %v2524_v41  ;;  %2296 = vmatmul.mubr.bf16.vlgmr.msra.gmra.mxu1 %v2165_v12 }
0x1196   :  { %v2526_v46 = vpop.xlane.xlu1 %2525 }
0x119a   :  { %v2528_v45 = vpop.xlane.xlu0 %2527 }
0x11d1   :  { %v2297_v20 = vpop.f32.mrf.mxu1 }
0x11d2   :  { %v2319_v25 = vmul.f32 %v2312_v22, %v2297_v20 }
0x11d3   :  { %v2299_v19 = vpop.f32.mrf.mxu1 }
0x11d4   :  { %v2732_v16 = vmul.f32 -1.442695, %v2319_v25  ;;  %v2320_v23 = vmul.f32 %v2316_v21, %v2299_v19 }
0x11d5   :  { %v2301_v27 = vpop.f32.mrf.mxu1 }
0x11d6   :  { %v2733_v28 = vmul.f32 -1.442695, %v2320_v23  ;;  %v2321_v29 = vmul.f32 %v2312_v22, %v2301_v27  ;;  %3434 = vpow2.f32 %v2732_v16 }
0x11d7   :  { %v2303_v30 = vpop.f32.mrf.mxu1 }
0x11d8   :  { %3436 = vpow2.f32 %v2733_v28  ;;  %v2734_v52 = vmul.f32 -1.442695, %v2321_v29  ;;  %v2322_v53 = vmul.f32 %v2316_v21, %v2303_v30 }
0x11da   :  { %3438 = vpow2.f32 %v2734_v52  ;;  %v2735_v24 = vmul.f32 -1.442695, %v2322_v53 }
0x11dc   :  { %3440 = vpow2.f32 %v2735_v24 }
0x11e3   :  { %v3435_v17 = vpop.eup %3434 }
0x11e4   :  { %v2335_v51 = vadd.f32 1.0, %v3435_v17 }
0x11e5   :  { %v3437_v48 = vpop.eup %3436 }
0x11e6   :  { %v2336_v1 = vadd.f32 1.0, %v3437_v48 }
0x11e7   :  { %v3439_v4 = vpop.eup %3438 }
0x11e8   :  { %v2337_v54 = vadd.f32 1.0, %v3439_v4  ;;  %3442 = vrcp.f32 %v2336_v1 }
0x11e9   :  { %v3441_v47 = vpop.eup %3440 }
0x11ea   :  { %3444 = vrcp.f32 %v2337_v54  ;;  %v2338_v56 = vadd.f32 1.0, %v3441_v47 }
0x11eb   :  { %3446 = vrcp.f32 %v2335_v51 }
0x11ec   :  { %3448 = vrcp.f32 %v2338_v56 }
0x11ed   :  { %3450 = vrsqrt.f32 %v2526_v46 }
0x11f5   :  { %v3443_v55 = vpop.eup %3442 }
0x11f6   :  { %v2348_v7 = vmul.f32 %v3443_v55, %v2320_v23 }
0x11f7   :  { %v3445_v58 = vpop.eup %3444 }
0x11f8   :  { %v3447_v60 = vpop.eup %3446  ;;  %v2349_v2 = vmul.f32 %v3445_v58, %v2321_v29 }
0x11f9   :  { %v3449_v63 = vpop.eup %3448  ;;  %v2347_v57 = vmul.f32 %v3447_v60, %v2319_v25 }
0x11fa   :  { %v2350_v49 = vmul.f32 %v3449_v63, %v2322_v53  ;;  %v3451_v12 = vpop.eup %3450 }
0x11fb   :  { %v2351_v59 = vpack.c.bf16 %v2349_v2, %v2347_v57  ;;  %v2531_v8 = vmul.f32 %v3451_v12, %v4288_v36 }
0x11fc   :  { %v2352_v31 = vpack.c.bf16 %v2350_v49, %v2348_v7 }
0x11fe   :  { %2514 = vmatprep.mubr.bf16.mxu0 %v2352_v31 }
0x11ff   :  { %2515 = vmatmul.mubr.bf16.vlgmr.msra.gmra.mxu0 %v2351_v59 }
0x12bf   :  { %v2904_v61 = vpop.f32.mrf.mxu0 }
0x12c1   :  { %v2905_v62 = vpop.f32.mrf.mxu0 }
0x12c2   :  { %v2906_v50 = vadd.f32 %v2905_v62, %v2904_v61 }
0x12c3   :  { %v2907_v32 = vpop.f32.mrf.mxu0 }
0x12c4   :  { %v2533_v33 = vmul.f32 %v2906_v50, %v2906_v50 }
0x12c5   :  { %v2908_v38 = vpop.f32.mrf.mxu0 }
0x12c6   :  { %v2909_v39 = vadd.f32 %v2908_v38, %v2907_v32  ;;  %2535 = vadd.xlane.f32.xlu1 %v2533_v33 }
0x12c8   :  { %v2534_v42 = vmul.f32 %v2909_v39, %v2909_v39 }
0x12ca   :  { %2537 = vadd.xlane.f32.xlu0 %v2534_v42 }
0x134f   :  { %v2536_v18 = vpop.xlane.xlu1 %2535 }
0x1350   :  { %3452 = vrsqrt.f32 %v2536_v18 }
0x1351   :  { %3454 = vrsqrt.f32 %v2528_v45 }
0x1353   :  { %v2538_v41 = vpop.xlane.xlu0 %2537 }
0x1354   :  { %3456 = vrsqrt.f32 %v2538_v41 }
0x135d   :  { %v3453_v13 = vpop.eup %3452 }
0x135e   :  { %v2541_v11 = vmul.f32 %v3453_v13, %v2906_v50  ;;  %v3455_v34 = vpop.eup %3454 }
0x135f   :  { %v2532_v44 = vmul.f32 %v3455_v34, %v4292_v9 }
0x1360   :  { %v2545_v40 = vsub.f32 %v2541_v11, %v2531_v8 }
0x1361   :  { %v3457_v5 = vpop.eup %3456 }
0x1362   :  { %v2553_v10 = vmul.f32 %v2753_v6, %v2545_v40  ;;  %v2542_v14 = vmul.f32 %v3457_v5, %v2909_v39 }
0x1364   :  { %v2555_v3 = vadd.f32 %v2553_v10, %v2531_v8  ;;  %v2546_v35 = vsub.f32 %v2542_v14, %v2532_v44 }
0x1366   :  { %v2557_v15 = vmul.f32 %v2555_v3, %v2555_v3  ;;  %v2554_v37 = vmul.f32 %v2753_v6, %v2546_v35 }
0x1368   :  { %2559 = vadd.xlane.f32.xlu1 %v2557_v15  ;;  %v2556_v26 = vadd.f32 %v2554_v37, %v2532_v44 }
0x136a   :  { %v2558_v0 = vmul.f32 %v2556_v26, %v2556_v26 }
0x136c   :  { %2561 = vadd.xlane.f32.xlu0 %v2558_v0 }
0x13f1   :  { %v2560_v36 = vpop.xlane.xlu1 %2559 }
0x13f2   :  { %3458 = vrsqrt.f32 %v2560_v36 }
0x13f5   :  { %v2562_v43 = vpop.xlane.xlu0 %2561 }
0x13f6   :  { %3460 = vrsqrt.f32 %v2562_v43 }
0x13ff   :  { %v3459_v22 = vpop.eup %3458 }
0x1400   :  { %v2565_v21 = vmul.f32 %v3459_v22, %v2555_v3 }
0x1402   :  { %2567 = vst [vmem:[#allocation22] sm:$0xff] %v2565_v21 }
0x1403   :  { %v3461_v20 = vpop.eup %3460 }
0x1404   :  { %v2566_v9 = vmul.f32 %v3461_v20, %v2556_v26 }
0x1406   :  { %2568 = vst [vmem:[#allocation22 + $0x8] sm:$0xff] %v2566_v9 }
0x1407   :  { %3722 = shalt.err (!%p3719_p8)
}
0x1408   :  { %2580 = dma.vmem_to_hbm [thread:$0]  %s2575_s29, 256, %s4332_s16, [#allocation4], %s3749_s26, %s3749_s26, %s3750_s27  }
0x1409   :  { %3745 = dma.done.wait [#allocation4], 256  }
0x140a   :  { %3746 = vsyncadd [#allocation4], 4294967040 }
0x140b   :  { %2584 = vsyncpa [#allocation3], 1 }
0x140c   :  { %2585 = vsyncpa [#allocation6], 1 }
0x140d   :  { %2586 = vsyncpa [#allocation9], 1 }
0x140e   :  { %2587 = vsyncpa [#allocation12], 1 }
0x140f   :  { %2588 = vsyncpa [#allocation15], 1 }
0x1410   :  { %2589 = vsyncpa [#allocation18], 1 }
0x1411   :  { %2590 = vsyncpa [#allocation21], 1 }
0x1412   :  { %2591 = vsyncpa [#allocation4], 1 }

</bundles_post_ra>
